<compile_context>
chip_gen: v6e
topology: v6e:2x2x1
jax: 0.10.0
libtpu: 0.0.40
codegen_flags: <defaults>
</compile_context>

<pallas_src>
import functools

import jax
import jax.numpy as jnp
from jax.experimental import pallas as pl
from jax.experimental.pallas import tpu as pltpu


def _round_up(x, m):
    return ((x + m - 1) // m) * m


def _sle_kernel(x_ref, w1_ref, b1_ref, w2_ref, b2_ref, out_ref, *, n_act):
    """One node-tile of the fused SLE forward.

    x_ref  : [TN, L1]   fused [hop feats | lbl_mean | 0-pad] stream (mxu dtype)
    w1_ref : [L1, M1]   block-diag hop weights + identity label pass-through
    b1_ref : [1, M1]    hop biases (zeros elsewhere), f32
    w2_ref : [M1, C]    vstack([w_post]*K + [w_lbl] + 0-pad)
    b2_ref : [1, C]     b_post + b_lbl, f32
    out_ref: [TN, C]    f32 logits
    n_act  : K*Hd; columns [0, n_act) are hop activations (ReLU'd), columns
             >= n_act are the linear label pass-through / zero padding.
    """
    # matmul #1: all K hop encoders + label pass-through in one MXU pass.
    h = jnp.dot(x_ref[...], w1_ref[...],
                preferred_element_type=jnp.float32)            # [TN, M1] f32
    h = h + b1_ref[...]
    # Selective ReLU: hop columns only (label pass-through must stay linear).
    lane = jax.lax.broadcasted_iota(jnp.int32, h.shape, dimension=1)
    h = jnp.where(lane < n_act, jnp.maximum(h, 0.0), h)

    # matmul #2: hop-sum + post-encoder + label projection in one MXU pass.
    out = jnp.dot(h.astype(w2_ref.dtype), w2_ref[...],
                  preferred_element_type=jnp.float32)          # [TN, C] f32
    # NOTE: C < 128 so this store is lane-masked; emit bf16 (or a packed
    # [N/8, 8*C] slab) if downstream tolerates, once reads are tuned.
    out_ref[...] = (out + b2_ref[...]).astype(out_ref.dtype)


def sle_forward(feats, w_hop, b_hop, w_post, b_post, label_emb, w_lbl, b_lbl,
                *, tile_n=1024, use_bf16=True):
    """SLEModel forward. feats [K,N,D], label_emb [N,Hh,Cin] -> [N,C] f32."""
    K, N, D = feats.shape
    Hd = w_hop.shape[2]
    Cin = label_emb.shape[2]
    C = w_post.shape[1]

    mxu_dtype = jnp.bfloat16 if use_bf16 else jnp.float32

    # ---- one-time algebraic fusions in the wrapper (XLA side) --------------
    # (a) head-mean hoist: mean_h(x_h @ W + b) == (mean_h x_h) @ W + b.
    lbl_mean = jnp.mean(label_emb.astype(jnp.float32), axis=1)       # [N, Cin]
    # (b) single lane-dense input stream: [hop0 | ... | hop(K-1) | lbl | 0-pad].
    feats_flat = jnp.transpose(feats, (1, 0, 2)).reshape(N, K * D)
    L_in = K * D + Cin
    L1 = _round_up(L_in, 128)
    x = jnp.concatenate([feats_flat, lbl_mean], axis=1)
    x = jnp.pad(x, ((0, 0), (0, L1 - L_in))).astype(mxu_dtype)       # [N, L1]
    # (c) matmul-#1 weight: block-diagonal hop weights + identity pass-through.
    n_act = K * Hd
    M1 = _round_up(n_act + Cin, 128)
    w1 = jnp.zeros((L1, M1), jnp.float32)
    for k in range(K):
        w1 = w1.at[k * D:(k + 1) * D, k * Hd:(k + 1) * Hd].set(w_hop[k])
    w1 = w1.at[K * D:K * D + Cin, n_act:n_act + Cin].set(jnp.eye(Cin))
    b1 = jnp.zeros((1, M1), jnp.float32).at[0, :n_act].set(b_hop.reshape(-1))
    # (d) matmul-#2 weight: hop-sum folded in (w_post stacked K times) + w_lbl.
    w2 = jnp.zeros((M1, C), jnp.float32)
    for k in range(K):
        w2 = w2.at[k * Hd:(k + 1) * Hd, :].set(w_post)
    w2 = w2.at[n_act:n_act + Cin, :].set(w_lbl)
    b2 = (b_post + b_lbl).reshape(1, C).astype(jnp.float32)

    # TODO(synk): at production SAGN dims (e.g. K=5, D=Hd=512) the resident
    # block-diagonal w1 double-buffered can exceed v7x's 64 MiB VMEM; at that
    # scale add a K grid axis ("arbitrary") with a per-hop [D,Hd] weight, or
    # keep w1 in pl.ANY/HBM and DMA it once into a single VMEM scratch.
    w1 = w1.astype(mxu_dtype)
    w2 = w2.astype(mxu_dtype)

    tile_n = min(tile_n, N)
    n_tiles = pl.cdiv(N, tile_n)

    itemsize = jnp.dtype(mxu_dtype).itemsize
    bytes_accessed = int(x.size * itemsize + w1.size * itemsize
                         + w2.size * itemsize + b1.size * 4 + b2.size * 4
                         + N * C * 4)
    flops = int(2 * N * (L1 * M1 + M1 * C))   # true MXU work of both matmuls

    kernel = functools.partial(_sle_kernel, n_act=n_act)

    return pl.pallas_call(
        kernel,
        out_shape=jax.ShapeDtypeStruct((N, C), jnp.float32),
        grid=(n_tiles,),
        in_specs=[
            pl.BlockSpec((tile_n, L1), lambda i: (i, 0)),   # fused input tile
            pl.BlockSpec((L1, M1), lambda i: (0, 0)),       # resident weight 1
            pl.BlockSpec((1, M1), lambda i: (0, 0)),        # bias 1
            pl.BlockSpec((M1, C), lambda i: (0, 0)),        # resident weight 2
            pl.BlockSpec((1, C), lambda i: (0, 0)),         # bias 2
        ],
        out_specs=pl.BlockSpec((tile_n, C), lambda i: (i, 0)),
        compiler_params=pltpu.CompilerParams(
            # node-tile axis is independent -> shards across both TCs on v7x
            dimension_semantics=("parallel",),
            # conservative explicit cap, safe on v7x's 64 MiB physical VMEM
            vmem_limit_bytes=32 * 1024 * 1024),
        cost_estimate=pl.CostEstimate(
            flops=flops, transcendentals=0, bytes_accessed=bytes_accessed),
    )(x, w1, b1, w2, b2)


def _xavier_normal(key, shape, gain):
    fan_in, fan_out = shape[-2], shape[-1]
    std = gain * (2.0 / (fan_in + fan_out)) ** 0.5
    return std * jax.random.normal(key, shape, dtype=jnp.float32)


def _reference(feats, w_hop, b_hop, w_post, b_post, label_emb, w_lbl, b_lbl):
    """Pure-JAX reference matching the PyTorch SLEModel forward."""
    h = jnp.einsum('knd,kdh->knh', feats, w_hop) + b_hop[:, None, :]
    hidden = jnp.sum(jnp.maximum(h, 0.0), axis=0)
    base_out = hidden @ w_post + b_post[None, :]
    lbl_out = jnp.einsum('nhc,cq->nhq', label_emb, w_lbl) + b_lbl[None, None, :]
    return base_out + lbl_out.mean(axis=1)       # SLEModel: out + label.mean(1)


if __name__ == "__main__":
    # Small shapes consistent with the SAGN SLE setup.
    K, N, D = 3, 2048, 32      # hops, nodes, input feature dim
    Hd = 32                    # per-hop encoder hidden dim
    Hh, Cin = 4, 16            # label-model heads, label embedding dim
    C = 16                     # num_classes
    TILE_N = 1024              # grid=(2,): even tile count keeps both v7x TCs busy

    key = jax.random.PRNGKey(0)
    ks = jax.random.split(key, 8)
    gain = 2.0 ** 0.5          # nn.init.calculate_gain('relu')

    feats = jax.random.normal(ks[0], (K, N, D), dtype=jnp.float32)
    label_emb = jax.random.normal(ks[1], (N, Hh, Cin), dtype=jnp.float32)

    # Deterministic init (xavier_normal, relu gain, zero biases), mirroring
    # SLEModel.previous_reset_parameters().
    w_hop = _xavier_normal(ks[2], (K, D, Hd), gain)
    b_hop = jnp.zeros((K, Hd), jnp.float32)
    w_post = _xavier_normal(ks[3], (Hd, C), gain)
    b_post = jnp.zeros((C,), jnp.float32)
    w_lbl = _xavier_normal(ks[4], (Cin, C), gain)
    b_lbl = jnp.zeros((C,), jnp.float32)

    out = sle_forward(feats, w_hop, b_hop, w_post, b_post,
                      label_emb, w_lbl, b_lbl, tile_n=TILE_N, use_bf16=True)
    out = jax.block_until_ready(out)

    # Reference on bf16-quantized inputs (the kernel feeds the MXU in bf16).
    q = lambda v: v.astype(jnp.bfloat16).astype(jnp.float32)
    ref = _reference(q(feats), q(w_hop), b_hop, q(w_post), b_post,
                     q(label_emb), q(w_lbl), b_lbl)

    assert out.shape == (N, C)
    err = float(jnp.max(jnp.abs(out - ref)))
    assert jnp.allclose(out, ref, atol=5e-2, rtol=5e-2), f"max abs err {err}"

    print("KERNEL_OK")
</pallas_src>

<mosaic_0001>
module attributes {stable_mosaic.version = 11 : i64} {
  func.func @_sle_kernel(%arg0: i32, %arg1: memref<1024x128xbf16, #tpu.memory_space<vmem>>, %arg2: memref<128x128xbf16, #tpu.memory_space<vmem>>, %arg3: memref<1x128xf32, #tpu.memory_space<vmem>>, %arg4: memref<128x16xbf16, #tpu.memory_space<vmem>>, %arg5: memref<1x16xf32, #tpu.memory_space<vmem>>, %arg6: memref<1024x16xf32, #tpu.memory_space<vmem>>) attributes {dimension_semantics = [#tpu.dimension_semantics<parallel>], iteration_bounds = array<i64: 2>, scalar_prefetch = 0 : i64, scratch_operands = 0 : i64, tpu.core_type = #tpu.core_type<tc>, window_params = [{transform_indices = @transform_0, window_bounds = array<i64: 1024, 128>}, {pipeline_mode = #tpu.pipeline_mode<synchronous>, transform_indices = @transform_1, window_bounds = array<i64: 128, 128>}, {pipeline_mode = #tpu.pipeline_mode<synchronous>, transform_indices = @transform_2, window_bounds = array<i64: 1, 128>}, {pipeline_mode = #tpu.pipeline_mode<synchronous>, transform_indices = @transform_3, window_bounds = array<i64: 128, 16>}, {pipeline_mode = #tpu.pipeline_mode<synchronous>, transform_indices = @transform_4, window_bounds = array<i64: 1, 16>}, {transform_indices = @transform_5, window_bounds = array<i64: 1024, 16>}]} {
    %c0 = arith.constant 0 : index
    %c0_0 = arith.constant 0 : index
    %0 = vector.load %arg1[%c0, %c0_0] : memref<1024x128xbf16, #tpu.memory_space<vmem>>, vector<1024x128xbf16>
    %c0_1 = arith.constant 0 : index
    %c0_2 = arith.constant 0 : index
    %1 = vector.load %arg2[%c0_1, %c0_2] : memref<128x128xbf16, #tpu.memory_space<vmem>>, vector<128x128xbf16>
    %cst = arith.constant dense<0.000000e+00> : vector<1024x128xf32>
    %2 = tpu.matmul %0, %1, %cst {dimension_numbers = #tpu.dot_dimension_numbers<[1], [0], [0], [1], [0, 0, 1, 1], [], []>} : vector<1024x128xbf16>, vector<128x128xbf16>, vector<1024x128xf32> -> vector<1024x128xf32>
    %c0_3 = arith.constant 0 : index
    %c0_4 = arith.constant 0 : index
    %3 = vector.load %arg3[%c0_3, %c0_4] : memref<1x128xf32, #tpu.memory_space<vmem>>, vector<1x128xf32>
    %4 = vector.broadcast %3 : vector<1x128xf32> to vector<1024x128xf32>
    %5 = arith.addf %2, %4 : vector<1024x128xf32>
    %6 = tpu.iota {dimensions = array<i32: 1>} : vector<1024x128xi32>
    %c96_i32 = arith.constant 96 : i32
    %7 = vector.broadcast %c96_i32 : i32 to vector<1024x128xi32>
    %8 = arith.cmpi slt, %6, %7 : vector<1024x128xi32>
    %cst_5 = arith.constant 0.000000e+00 : f32
    %9 = vector.broadcast %cst_5 : f32 to vector<1024x128xf32>
    %10 = arith.maximumf %5, %9 : vector<1024x128xf32>
    %11 = arith.select %8, %10, %5 : vector<1024x128xi1>, vector<1024x128xf32>
    %12 = arith.truncf %11 : vector<1024x128xf32> to vector<1024x128xbf16>
    %c0_6 = arith.constant 0 : index
    %c0_7 = arith.constant 0 : index
    %13 = vector.load %arg4[%c0_6, %c0_7] : memref<128x16xbf16, #tpu.memory_space<vmem>>, vector<128x16xbf16>
    %cst_8 = arith.constant dense<0.000000e+00> : vector<1024x16xf32>
    %14 = tpu.matmul %12, %13, %cst_8 {dimension_numbers = #tpu.dot_dimension_numbers<[1], [0], [0], [1], [0, 0, 1, 1], [], []>} : vector<1024x128xbf16>, vector<128x16xbf16>, vector<1024x16xf32> -> vector<1024x16xf32>
    %c0_9 = arith.constant 0 : index
    %c0_10 = arith.constant 0 : index
    %15 = vector.load %arg5[%c0_9, %c0_10] : memref<1x16xf32, #tpu.memory_space<vmem>>, vector<1x16xf32>
    %16 = vector.broadcast %15 : vector<1x16xf32> to vector<1024x16xf32>
    %17 = arith.addf %14, %16 : vector<1024x16xf32>
    %c0_11 = arith.constant 0 : index
    %c0_12 = arith.constant 0 : index
    %18 = vector.load %arg6[%c0_11, %c0_12] : memref<1024x16xf32, #tpu.memory_space<vmem>>, vector<1024x16xf32>
    tpu.vector_store %arg6[%c0_11, %c0_12], %17 {strides = array<i32>} : memref<1024x16xf32, #tpu.memory_space<vmem>>, vector<1024x16xf32>,
    return
  }
  func.func @transform_0(%arg0: i32) -> (i32, i32) {
    %c0_i32 = arith.constant 0 : i32
    %c0_i32_0 = arith.constant 0 : i32
    return %arg0, %c0_i32 : i32, i32
  }
  func.func @transform_1(%arg0: i32) -> (i32, i32) {
    %c0_i32 = arith.constant 0 : i32
    %c0_i32_0 = arith.constant 0 : i32
    %c0_i32_1 = arith.constant 0 : i32
    return %c0_i32, %c0_i32_0 : i32, i32
  }
  func.func @transform_2(%arg0: i32) -> (i32, i32) {
    %c0_i32 = arith.constant 0 : i32
    %c0_i32_0 = arith.constant 0 : i32
    %c0_i32_1 = arith.constant 0 : i32
    return %c0_i32, %c0_i32_0 : i32, i32
  }
  func.func @transform_3(%arg0: i32) -> (i32, i32) {
    %c0_i32 = arith.constant 0 : i32
    %c0_i32_0 = arith.constant 0 : i32
    %c0_i32_1 = arith.constant 0 : i32
    return %c0_i32, %c0_i32_0 : i32, i32
  }
  func.func @transform_4(%arg0: i32) -> (i32, i32) {
    %c0_i32 = arith.constant 0 : i32
    %c0_i32_0 = arith.constant 0 : i32
    %c0_i32_1 = arith.constant 0 : i32
    return %c0_i32, %c0_i32_0 : i32, i32
  }
  func.func @transform_5(%arg0: i32) -> (i32, i32) {
    %c0_i32 = arith.constant 0 : i32
    %c0_i32_0 = arith.constant 0 : i32
    return %arg0, %c0_i32 : i32, i32
  }
}

</mosaic_0001>

<bundles_post_ra>
// kernel: tpu_custom_call.1
= control target key start
LH: loop header
LB: loop body
LE: loop exit
PB: predicated region body
PF: predicated region fallthrough
CT: control target
= control target key end

     0   :  { %10 = vsyncpa [#allocation3], 0  ;;  %s4260_s0 = inlined_call_operand.hbm [shape: bf16[2048,128], index: 0, kind: input, shape index: {}]   ;;  %s4261_s1 = inlined_call_operand.vmem [shape: bf16[128,128], index: 1, kind: input, shape index: {}]   ;;  %s4262_s2 = inlined_call_operand.vmem [shape: f32[1,128], index: 2, kind: input, shape index: {}]   ;;  %s4263_s3 = inlined_call_operand.vmem [shape: bf16[128,16], index: 3, kind: input, shape index: {}]   ;;  %s4264_s4 = inlined_call_operand.vmem [shape: f32[1,16], index: 4, kind: input, shape index: {}]   ;;  %s4265_s5 = inlined_call_operand.vmem [shape: f32[2048,16], index: 5, kind: output, shape index: {}]  }
   0x1   :  { %12 = vsyncpa [#allocation3 + $0x1], 0  ;;  %s3259_s18 = smov 0   ;;  %s3261_s19 = smov 0  }
   0x2   :  { %s3263_s20 = smov 0   ;;  %s3265_s21 = smov 0  }
   0x3 LB: > { %s2511_s22 = sadd.s32 4294967295, %s3224_s21   ;;  %s3279_s23 = sadd.s32 1, %s3224_s21   ;;  %s3224_s21 = sphi %s3265_s21, %s4274_s21   ;;  %s3220_s20 = sphi %s3263_s20, %s4273_s20   ;;  %s3216_s19 = sphi %s3261_s19, %s4272_s19   ;;  %s3212_s18 = sphi %s3259_s18, %s4271_s18  }
   0x4   : > { %s22_s24 = ssub.s32 %s3224_s21, %s3279_s23  ;;  %s25_s25 = sadd.s32 1, %s3220_s20 }
   0x5   : > { %p23_p0 = scmp.eq.s32.totalorder %s22_s24, 0  ;;  %p32_p1 = scmp.ne.s32.totalorder %s3220_s20, %s3216_s19 }
   0x6   : > { %p33_p2 = scmp.eq.s32.totalorder %s3224_s21, 0  ;;  %p38_p3 = scmp.ne.s32.totalorder %s3216_s19, %s3212_s18 }
   0x7   : > { %s3289_s26 = scalar_select %p23_p0, %s3220_s20, %s25_s25  }
   0x8   : > { %p34_p4 = por %p33_p2, %p32_p1  ;;  %p39_p5 = scmp.eq.s32.totalorder %s2511_s22, 0 }
   0x9   : > { %p3045_p6 = scmp.lt.s32.totalorder %s3224_s21, 2  ;;  %s184_s28 = sand.u32 1, %s3220_s20  }
   0xa   : > { %p3294_p7 = por %p39_p5, %p38_p3  ;;  %s2515_s29 = sshll.u32 %s184_s28, 9 }
   0xb   : > { %s2606_s30 = sshll.u32 %s3224_s21, 13  ;;  %s188_s9 = scalar_lea.vmem [#allocation2], %s2515_s29 }
   0xc   : > { %s4267_s27 = scalar_select %p3294_p7, 1, 0 }
   0xd   : > { %s3303_s8 = scalar_lea.hbm %s4260_s0, %s2606_s30  ;;  %s195_s10 = sshll.u32 %s188_s9, 4  ;;  %s3305_s10 = int_to_ptr.vmem [resolvable:$true] %s195_s10 }
   0xe   : > { %p3307_p8 = pnand %p3045_p6, %p34_p4  ;;  %s3312_s12 = scalar_lea.sflag [#allocation3], %s184_s28 }
   0xf   : > { %s3162_s13 = scalar_lea.hbm %s3303_s8, 8192  ;;  %s3167_s16 = scalar_lea.hbm %s4260_s0, 16384 }
  0x10   : > { %p3163_p10 = scmp.ne.s32.totalorder %s3303_s8, %s3162_s13  ;;  %p3164_p11 = pneg %p3307_p8 }
  0x11   : > { %p3168_p0 = scmp.lt.s32.totalorder %s3303_s8, %s4260_s0  ;;  %p3169_p1 = scmp.lt.s32.totalorder %s3167_s16, %s3162_s13 }
  0x12   : > { %p3165_p12 = pnand %p3164_p11, %p3163_p10 }
  0x13   : > { %p3170_p2 = por %p3169_p1, %p3168_p0 }
  0x14   : > { %p3166_p13 = pneg %p3165_p12 }
  0x16   : > { %p3171_p3 = pnand %p3170_p2, %p3166_p13 }
  0x18   : > { %3174 = shalt.err (!%p3171_p3)
}
  0x19   : > { %s3175_s24 = scalar_lea.vmem %s3305_s10, 8192  ;;  %s3226_s25 = smov [#allocation2]  }
  0x1a   : > { %p3176_p4 = scmp.ne.s32.totalorder %s3305_s10, %s3175_s24  ;;  %s3180_s28 = sshll.u32 %s3226_s25, 4  ;;  %s3181_s28 = int_to_ptr.vmem [resolvable:$false] %s3180_s28 }
  0x1b   : > { %s3182_s29 = scalar_lea.vmem %s3181_s28, 16384  ;;  %p3183_p10 = scmp.lt.s32.totalorder %s3305_s10, %s3181_s28 }
  0x1c   : > { %p3178_p5 = pnand %p3176_p4, %p3164_p11  ;;  %p3184_p12 = scmp.lt.s32.totalorder %s3182_s29, %s3175_s24 }
  0x1e   : > { %p3179_p6 = pneg %p3178_p5  ;;  %p3185_p9 = por %p3184_p12, %p3183_p10 }
  0x20   : > { %p3186_p7 = pnand %p3185_p9, %p3179_p6 }
  0x22   : > { %3189 = shalt.err (!%p3186_p7)
}
  0x23   : > { %s3227_s30 = smov 64   ;;  %s3228_s6 = smov 4  }
  0x24   : > { %3044 = dma.hbm_to_vmem [thread:$0]  (!%p3307_p8), %s3303_s8, 8192, %s3305_s10, %s3312_s12, %s3227_s30, %s3227_s30, %s3228_s6  }
  0x25   : > { %p203_p11 = scmp.lt.s32.totalorder %s3224_s21, 3  ;;  %p4269_p13 = scmp.ge.s32.totalorder %s3224_s21, 1 }
  0x27   : > { %p204_p0 = pnand %p4269_p13, %p203_p11 }
  0x28   : > { %s209_s7 = sand.u32 (!%p204_p0), 1, %s3216_s19   ;;  %p4270_p7 = scmp.ne.s32.totalorder (!%p204_p0), %s4267_s27, 0 }
  0x29   : > { %207 = sbr.rel (%p204_p0) target bundleno = 737 (0x2e1), region = 40  ;;  %s2519_s9 = sshll.u32 (!%p204_p0), %s209_s7, 9 }
  0x2a   : > { %s210_s13 = scalar_lea.sflag (!%p204_p0), [#allocation3], %s209_s7  ;;  %s3337_s14 = scalar_lea.vmem (!%p204_p0), [#allocation2], %s2519_s9 }
  0x2e   : > { %3207 = dma.done.wait (%p4270_p7), %s210_s13, 8192  }
  0x2f   : > { %3209 = vsyncadd (%p4270_p7), %s210_s13, 4294959104  ;;  %v3080_v0 = vld [vmem:[%s4261_s1 + $0x38] sm:$0xff]   ;;  %v3081_v1 = vld [vmem:[%s4261_s1 + $0x30] sm:$0xff]   ;;  %vm2315_vm1 = vcmask 130048  }
  0x30   : > { %2751 = vmatprep.subr.bf16.mxu0 %v3080_v0  ;;  %v3082_v2 = vld [vmem:[%s4261_s1 + $0x28] sm:$0xff]   ;;  %v3083_v3 = vld [vmem:[%s4261_s1 + $0x20] sm:$0xff]   ;;  %v3084_v5 = vld [vmem:[%s4261_s1 + $0x18] sm:$0xff]  }
  0x31   : > { %2752 = vmatpush3.bf16.msra.mxu0 %v3080_v0  ;;  %v3088_v4 = vld [vmem:[%s3337_s14] sm:$0xff]   ;;  %v3085_v6 = vld [vmem:[%s4261_s1 + $0x10] sm:$0xff]   ;;  %v3086_v7 = vld [vmem:[%s4261_s1 + $0x8] sm:$0xff]  }
  0x32   : > { %2753 = vmatprep.subr.bf16.mxu0 %v3081_v1  ;;  %2767 = vmatprep.mubr.bf16.mxu0 %v3088_v4  ;;  %v3087_v8 = vld [vmem:[%s4261_s1] sm:$0xff]   ;;  %v3089_v9 = vld [vmem:[%s3337_s14 + $0x8] sm:$0xff]   ;;  %v3090_v10 = vld [vmem:[%s3337_s14 + $0x10] sm:$0xff]  }
  0x33   : > { %v3091_v11 = vld [vmem:[%s3337_s14 + $0x18] sm:$0xff]   ;;  %v3092_v12 = vld [vmem:[%s3337_s14 + $0x20] sm:$0xff]   ;;  %v3093_v13 = vld [vmem:[%s3337_s14 + $0x28] sm:$0xff]  }
  0x34   : > { %v3094_v14 = vld [vmem:[%s3337_s14 + $0x30] sm:$0xff]   ;;  %v3095_v15 = vld [vmem:[%s3337_s14 + $0x38] sm:$0xff]   ;;  %v3096_v16 = vld [vmem:[%s3337_s14 + $0x40] sm:$0xff]  }
  0x35   : > { %2754 = vmatpush3.bf16.msra.mxu0 %v3081_v1  ;;  %v3097_v17 = vld [vmem:[%s3337_s14 + $0x48] sm:$0xff]   ;;  %v3098_v18 = vld [vmem:[%s3337_s14 + $0x50] sm:$0xff]   ;;  %v3099_v19 = vld [vmem:[%s3337_s14 + $0x58] sm:$0xff]  }
  0x36   : > { %2755 = vmatprep.subr.bf16.mxu0 %v3082_v2  ;;  %v3100_v20 = vld [vmem:[%s3337_s14 + $0x60] sm:$0xff]   ;;  %v3133_v21 = vld [vmem:[%s4263_s3 + $0x38] sm:$0xff]   ;;  %v3101_v22 = vld [vmem:[%s3337_s14 + $0x68] sm:$0xff]  }
  0x37   : > { %2895 = vmatprep.subr.bf16.mxu1 %v3133_v21  ;;  %v3102_v23 = vld [vmem:[%s3337_s14 + $0x70] sm:$0xff]   ;;  %v3137_v25 = vld [vmem:[%s4263_s3 + $0x28] sm:$0xff]   ;;  %v3103_v26 = vld [vmem:[%s3337_s14 + $0x78] sm:$0xff]  }
  0x38   : > { %2896 = vmatpush3.bf16.msra.mxu1 %v3133_v21  ;;  %v3135_v24 = vld [vmem:[%s4263_s3 + $0x30] sm:$0xff]   ;;  %v3104_v27 = vld [vmem:[%s3337_s14 + $0x80] sm:$0xff]   ;;  %v3141_v29 = vld [vmem:[%s4263_s3 + $0x18] sm:$0xff]  }
  0x39   : > { %2756 = vmatpush3.bf16.msra.mxu0 %v3082_v2  ;;  %2897 = vmatprep.subr.bf16.mxu1 %v3135_v24  ;;  %v3139_v28 = vld [vmem:[%s4263_s3 + $0x20] sm:$0xff]   ;;  %v3105_v30 = vld [vmem:[%s3337_s14 + $0x88] sm:$0xff]   ;;  %v3106_v31 = vld [vmem:[%s3337_s14 + $0x90] sm:$0xff]  }
  0x3a   : > { %2757 = vmatprep.subr.bf16.mxu0 %v3083_v3  ;;  %v3143_v32 = vld [vmem:[%s4263_s3 + $0x10] sm:$0xff]   ;;  %v3107_v33 = vld [vmem:[%s3337_s14 + $0x98] sm:$0xff]   ;;  %v3108_v34 = vld [vmem:[%s3337_s14 + $0xa0] sm:$0xff]  }
  0x3b   : > { %v3145_v35 = vld [vmem:[%s4263_s3 + $0x8] sm:$0xff]   ;;  %v3147_v36 = vld [vmem:[%s4263_s3] sm:$0xff]   ;;  %v3110_v38 = vld [vmem:[%s3337_s14 + $0xb0] sm:$0xff]  }
  0x3c   : > { %2898 = vmatpush3.bf16.msra.mxu1 %v3135_v24  ;;  %v3109_v37 = vld [vmem:[%s3337_s14 + $0xa8] sm:$0xff]   ;;  %v3111_v39 = vld [vmem:[%s3337_s14 + $0xb8] sm:$0xff]   ;;  %v3112_v40 = vld [vmem:[%s3337_s14 + $0xc0] sm:$0xff]  }
  0x3d   : > { %2758 = vmatpush3.bf16.msra.mxu0 %v3083_v3  ;;  %2899 = vmatprep.subr.bf16.mxu1 %v3137_v25  ;;  %v3113_v41 = vld [vmem:[%s3337_s14 + $0xc8] sm:$0xff]   ;;  %v3114_v42 = vld [vmem:[%s3337_s14 + $0xd0] sm:$0xff]   ;;  %v3115_v43 = vld [vmem:[%s3337_s14 + $0xd8] sm:$0xff]  }
  0x3e   : > { %2759 = vmatprep.subr.bf16.mxu0 %v3084_v5  ;;  %v3116_v44 = vld [vmem:[%s3337_s14 + $0xe0] sm:$0xff]   ;;  %v3117_v45 = vld [vmem:[%s3337_s14 + $0xe8] sm:$0xff]   ;;  %v3118_v46 = vld [vmem:[%s3337_s14 + $0xf0] sm:$0xff]  }
  0x3f   : > { %v3119_v47 = vld [vmem:[%s3337_s14 + $0xf8] sm:$0xff]   ;;  %v3120_v48 = vld [vmem:[%s3337_s14 + $0x100] sm:$0xff]   ;;  %v3121_v49 = vld [vmem:[%s3337_s14 + $0x108] sm:$0xff]  }
  0x40   : > { %2900 = vmatpush3.bf16.msra.mxu1 %v3137_v25  ;;  %v3122_v50 = vld [vmem:[%s3337_s14 + $0x110] sm:$0xff]   ;;  %v3123_v51 = vld [vmem:[%s3337_s14 + $0x118] sm:$0xff]   ;;  %v3124_v52 = vld [vmem:[%s3337_s14 + $0x120] sm:$0xff]  }
  0x41   : > { %2760 = vmatpush3.bf16.msra.mxu0 %v3084_v5  ;;  %2901 = vmatprep.subr.bf16.mxu1 %v3139_v28  ;;  %v3125_v53 = vld [vmem:[%s3337_s14 + $0x128] sm:$0xff]   ;;  %v3126_v54 = vld [vmem:[%s3337_s14 + $0x130] sm:$0xff]   ;;  %v3127_v55 = vld [vmem:[%s3337_s14 + $0x138] sm:$0xff]   ;;  %v1376_v5 = vlaneseq }
  0x42   : > { %2761 = vmatprep.subr.bf16.mxu0 %v3085_v6  ;;  %v3128_v56 = vld [vmem:[%s3337_s14 + $0x140] sm:$0xff]   ;;  %v3129_v57 = vld [vmem:[%s3337_s14 + $0x148] sm:$0xff]   ;;  %v3130_v58 = vld [vmem:[%s3337_s14 + $0x150] sm:$0xff]  }
  0x43   : > { %v3131_v59 = vld [vmem:[%s3337_s14 + $0x158] sm:$0xff]   ;;  %v3132_v60 = vld [vmem:[%s3337_s14 + $0x160] sm:$0xff]   ;;  %v3134_v61 = vld [vmem:[%s3337_s14 + $0x168] sm:$0xff]  }
  0x44   : > { %2902 = vmatpush3.bf16.msra.mxu1 %v3139_v28  ;;  %v3136_v62 = vld [vmem:[%s3337_s14 + $0x170] sm:$0xff]   ;;  %v3138_v63 = vld [vmem:[%s3337_s14 + $0x178] sm:$0xff]   ;;  %v3140_v0 = vld [vmem:[%s3337_s14 + $0x180] sm:$0xff]  }
  0x45   : > { %2762 = vmatpush3.bf16.msra.mxu0 %v3085_v6  ;;  %2903 = vmatprep.subr.bf16.mxu1 %v3141_v29  ;;  %v3142_v1 = vld [vmem:[%s3337_s14 + $0x188] sm:$0xff]   ;;  %v3144_v2 = vld [vmem:[%s3337_s14 + $0x190] sm:$0xff]   ;;  %v3445_v4 = vld [vmem:[%s4262_s2] ss:$0 sm:$0xff] }
  0x46   : > { %2763 = vmatprep.subr.bf16.mxu0 %v3086_v7 }
  0x48   : > { %2904 = vmatpush3.bf16.msra.mxu1 %v3141_v29 }
  0x49   : > { %2764 = vmatpush3.bf16.msra.mxu0 %v3086_v7  ;;  %2905 = vmatprep.subr.bf16.mxu1 %v3143_v32 }
  0x4a   : > { %2765 = vmatprep.subr.bf16.mxu0 %v3087_v8 }
  0x4c   : > { %2906 = vmatpush3.bf16.msra.mxu1 %v3143_v32 }
  0x4d   : > { %2766 = vmatpush3.bf16.msra.mxu0 %v3087_v8  ;;  %2907 = vmatprep.subr.bf16.mxu1 %v3145_v35 }
  0x50   : > { %2768 = vmatmul.mubr.bf16.vlgmr.msra.gmra.mxu0 %v3089_v9  ;;  %2908 = vmatpush3.bf16.msra.mxu1 %v3145_v35 }
  0x51   : > { %2771 = vmatprep.mubr.bf16.mxu0 %v3090_v10  ;;  %2909 = vmatprep.subr.bf16.mxu1 %v3147_v36  ;;  %v3146_v10 = vld [vmem:[%s3337_s14 + $0x198] sm:$0xff]  }
  0x54   : > { %2910 = vmatpush3.bf16.msra.mxu1 %v3147_v36 }
  0x58   : > { %2772 = vmatmul.mubr.bf16.gmra.mxu0 %v3091_v11 }
  0x59   : > { %2775 = vmatprep.mubr.bf16.mxu0 %v3092_v12  ;;  %v3451_v12 = vand.u32 127, %v1376_v5 }
  0x5b   : > { %vm1378_vm0 = vcmp.lt.s32.totalorder %v3451_v12, 96 }
  0x60   : > { %2776 = vmatmul.mubr.bf16.gmra.mxu0 %v3093_v13  ;;  %v3148_v13 = vld [vmem:[%s3337_s14 + $0x1a0] sm:$0xff]  }
  0x61   : > { %2779 = vmatprep.mubr.bf16.mxu0 %v3094_v14 }
  0x68   : > { %2780 = vmatmul.mubr.bf16.gmra.mxu0 %v3095_v15 }
  0x69   : > { %2783 = vmatprep.mubr.bf16.mxu0 %v3096_v16 }
  0x70   : > { %2784 = vmatmul.mubr.bf16.gmra.mxu0 %v3097_v17 }
  0x71   : > { %2787 = vmatprep.mubr.bf16.mxu0 %v3098_v18 }
  0x78   : > { %2788 = vmatmul.mubr.bf16.gmra.mxu0 %v3099_v19 }
  0x79   : > { %2791 = vmatprep.mubr.bf16.mxu0 %v3100_v20 }
  0x80   : > { %2792 = vmatmul.mubr.bf16.gmra.mxu0 %v3101_v22 }
  0x81   : > { %2795 = vmatprep.mubr.bf16.mxu0 %v3102_v23 }
  0x88   : > { %2796 = vmatmul.mubr.bf16.gmra.mxu0 %v3103_v26 }
  0x89   : > { %2799 = vmatprep.mubr.bf16.mxu0 %v3104_v27 }
  0x90   : > { %2800 = vmatmul.mubr.bf16.gmra.mxu0 %v3105_v30  ;;  %v3149_v30 = vld [vmem:[%s3337_s14 + $0x1a8] sm:$0xff]  }
  0x91   : > { %2803 = vmatprep.mubr.bf16.mxu0 %v3106_v31 }
  0x98   : > { %2804 = vmatmul.mubr.bf16.gmra.mxu0 %v3107_v33  ;;  %v3150_v33 = vld [vmem:[%s3337_s14 + $0x1b0] sm:$0xff]  }
  0x99   : > { %2807 = vmatprep.mubr.bf16.mxu0 %v3108_v34 }
  0xa0   : > { %2808 = vmatmul.mubr.bf16.gmra.mxu0 %v3109_v37 }
  0xa1   : > { %2811 = vmatprep.mubr.bf16.mxu0 %v3110_v38 }
  0xa8   : > { %2812 = vmatmul.mubr.bf16.gmra.mxu0 %v3111_v39 }
  0xa9   : > { %2815 = vmatprep.mubr.bf16.mxu0 %v3112_v40 }
  0xb0   : > { %2816 = vmatmul.mubr.bf16.gmra.mxu0 %v3113_v41 }
  0xb1   : > { %2819 = vmatprep.mubr.bf16.mxu0 %v3114_v42 }
  0xb8   : > { %2820 = vmatmul.mubr.bf16.gmra.mxu0 %v3115_v43 }
  0xb9   : > { %2823 = vmatprep.mubr.bf16.mxu0 %v3116_v44 }
  0xc0   : > { %2824 = vmatmul.mubr.bf16.gmra.mxu0 %v3117_v45 }
  0xc1   : > { %2827 = vmatprep.mubr.bf16.mxu0 %v3118_v46 }
  0xc8   : > { %2828 = vmatmul.mubr.bf16.gmra.mxu0 %v3119_v47 }
  0xc9   : > { %2831 = vmatprep.mubr.bf16.mxu0 %v3120_v48 }
  0xd0   : > { %2832 = vmatmul.mubr.bf16.gmra.mxu0 %v3121_v49 }
  0xd1   : > { %2835 = vmatprep.mubr.bf16.mxu0 %v3122_v50  ;;  %v3151_v50 = vld [vmem:[%s3337_s14 + $0x1b8] sm:$0xff]  }
  0xd8   : > { %2836 = vmatmul.mubr.bf16.gmra.mxu0 %v3123_v51 }
  0xd9   : > { %2839 = vmatprep.mubr.bf16.mxu0 %v3124_v52 }
  0xe0   : > { %2840 = vmatmul.mubr.bf16.gmra.mxu0 %v3125_v53  ;;  %v3152_v53 = vld [vmem:[%s3337_s14 + $0x1c0] sm:$0xff]  }
  0xe1   : > { %2843 = vmatprep.mubr.bf16.mxu0 %v3126_v54 }
  0xe8   : > { %2844 = vmatmul.mubr.bf16.gmra.mxu0 %v3127_v55 }
  0xe9   : > { %2847 = vmatprep.mubr.bf16.mxu0 %v3128_v56 }
  0xf0   : > { %2848 = vmatmul.mubr.bf16.gmra.mxu0 %v3129_v57 }
  0xf1   : > { %2851 = vmatprep.mubr.bf16.mxu0 %v3130_v58 }
  0xf8   : > { %2852 = vmatmul.mubr.bf16.gmra.mxu0 %v3131_v59 }
  0xf9   : > { %2855 = vmatprep.mubr.bf16.mxu0 %v3132_v60 }
 0x100   : > { %2856 = vmatmul.mubr.bf16.gmra.mxu0 %v3134_v61 }
 0x101   : > { %2859 = vmatprep.mubr.bf16.mxu0 %v3136_v62 }
 0x108   : > { %2860 = vmatmul.mubr.bf16.gmra.mxu0 %v3138_v63 }
 0x109   : > { %2863 = vmatprep.mubr.bf16.mxu0 %v3140_v0 }
 0x110   : > { %v2769_v3 = vpop.f32.mrf.mxu0  ;;  %2864 = vmatmul.mubr.bf16.gmra.mxu0 %v3142_v1 }
 0x111   : > { %2867 = vmatprep.mubr.bf16.mxu0 %v3144_v2  ;;  %v874_v8 = vadd.f32 %v2769_v3, %v3445_v4 }
 0x112   : > { %v865_v6 = vpop.f32.mrf.mxu0 }
 0x113   : > { %v866_v7 = vadd.f32 %v3445_v4, %v865_v6  ;;  %v1381_v18 = vmax.f32 %v874_v8, 0.0 }
 0x114   : > { %v2770_v9 = vpop.f32.mrf.mxu0 }
 0x115   : > { %v877_v11 = vadd.f32 %v2770_v9, %v3445_v4  ;;  %v1379_v15 = vmax.f32 %v866_v7, 0.0  ;;  %v1509_v29 = vsel %vm1378_vm0, %v1381_v18, %v874_v8 }
 0x116   : > { %v868_v14 = vpop.f32.mrf.mxu0 }
 0x117   : > { %v1382_v16 = vmax.f32 %v877_v11, 0.0  ;;  %v869_v17 = vadd.f32 %v3445_v4, %v868_v14  ;;  %v1507_v24 = vsel %vm1378_vm0, %v1379_v15, %v866_v7  ;;  %v3153_v7 = vld [vmem:[%s3337_s14 + $0x1c8] sm:$0xff]  }
 0x118   : > { %v2773_v19 = vpop.f32.mrf.mxu0  ;;  %2868 = vmatmul.mubr.bf16.gmra.mxu0 %v3146_v10  ;;  %v3154_v10 = vld [vmem:[%s3337_s14 + $0x1d0] sm:$0xff]  }
 0x119   : > { %v1380_v20 = vmax.f32 %v869_v17, 0.0  ;;  %2871 = vmatprep.mubr.bf16.mxu0 %v3148_v13  ;;  %v1510_v22 = vsel %vm1378_vm0, %v1382_v16, %v877_v11  ;;  %v890_v26 = vadd.f32 %v2773_v19, %v3445_v4 }
 0x11a   : > { %v881_v21 = vpop.f32.mrf.mxu0  ;;  %v1636_v32 = vpack.c.bf16 %v1510_v22, %v1509_v29 }
 0x11b   : > { %v882_v23 = vadd.f32 %v3445_v4, %v881_v21  ;;  %v1508_v25 = vsel %vm1378_vm0, %v1380_v20, %v869_v17  ;;  %v1385_v38 = vmax.f32 %v890_v26, 0.0 }
 0x11c   : > { %v2774_v27 = vpop.f32.mrf.mxu0  ;;  %v1635_v28 = vpack.c.bf16 %v1508_v25, %v1507_v24 }
 0x11d   : > { %v893_v31 = vadd.f32 %v2774_v27, %v3445_v4  ;;  %v1383_v35 = vmax.f32 %v882_v23, 0.0  ;;  %v1513_v49 = vsel %vm1378_vm0, %v1385_v38, %v890_v26 }
 0x11e   : > { %v884_v34 = vpop.f32.mrf.mxu0  ;;  %2911 = vmatprep.mubr.bf16.mxu1 %v1635_v28  ;;  %v3155_v28 = vld [vmem:[%s3337_s14 + $0x1d8] sm:$0xff]  }
 0x11f   : > { %v1386_v36 = vmax.f32 %v893_v31, 0.0  ;;  %v885_v37 = vadd.f32 %v3445_v4, %v884_v34  ;;  %2912 = vmatmul.mubr.bf16.vlgmr.msra.gmra.mxu1 %v1636_v32  ;;  %v1511_v44 = vsel %vm1378_vm0, %v1383_v35, %v882_v23 }
 0x120   : > { %v2777_v39 = vpop.f32.mrf.mxu0  ;;  %2872 = vmatmul.mubr.bf16.gmra.mxu0 %v3149_v30 }
 0x121   : > { %v1384_v40 = vmax.f32 %v885_v37, 0.0  ;;  %2875 = vmatprep.mubr.bf16.mxu0 %v3150_v33  ;;  %v1514_v42 = vsel %vm1378_vm0, %v1386_v36, %v893_v31  ;;  %v906_v46 = vadd.f32 %v2777_v39, %v3445_v4  ;;  %v3156_v31 = vld [vmem:[%s3337_s14 + $0x1e0] sm:$0xff]  }
 0x122   : > { %v897_v41 = vpop.f32.mrf.mxu0  ;;  %v1638_v52 = vpack.c.bf16 %v1514_v42, %v1513_v49 }
 0x123   : > { %v898_v43 = vadd.f32 %v3445_v4, %v897_v41  ;;  %v1512_v45 = vsel %vm1378_vm0, %v1384_v40, %v885_v37  ;;  %v1389_v58 = vmax.f32 %v906_v46, 0.0 }
 0x124   : > { %v2778_v47 = vpop.f32.mrf.mxu0  ;;  %v1637_v48 = vpack.c.bf16 %v1512_v45, %v1511_v44 }
 0x125   : > { %v909_v51 = vadd.f32 %v2778_v47, %v3445_v4  ;;  %v1387_v55 = vmax.f32 %v898_v43, 0.0  ;;  %v1517_v6 = vsel %vm1378_vm0, %v1389_v58, %v906_v46 }
 0x126   : > { %v900_v54 = vpop.f32.mrf.mxu0  ;;  %2915 = vmatprep.mubr.bf16.mxu1 %v1637_v48  ;;  %v3157_v48 = vld [vmem:[%s3337_s14 + $0x1e8] sm:$0xff]  }
 0x127   : > { %v1390_v56 = vmax.f32 %v909_v51, 0.0  ;;  %v901_v57 = vadd.f32 %v3445_v4, %v900_v54  ;;  %2916 = vmatmul.mubr.bf16.gmra.mxu1 %v1638_v52  ;;  %v1515_v0 = vsel %vm1378_vm0, %v1387_v55, %v898_v43 }
 0x128   : > { %v2781_v59 = vpop.f32.mrf.mxu0  ;;  %2876 = vmatmul.mubr.bf16.gmra.mxu0 %v3151_v50 }
 0x129   : > { %v1388_v60 = vmax.f32 %v901_v57, 0.0  ;;  %2879 = vmatprep.mubr.bf16.mxu0 %v3152_v53  ;;  %v1518_v62 = vsel %vm1378_vm0, %v1390_v56, %v909_v51  ;;  %v922_v2 = vadd.f32 %v2781_v59, %v3445_v4  ;;  %v3158_v51 = vld [vmem:[%s3337_s14 + $0x1f0] sm:$0xff]  }
 0x12a   : > { %v913_v61 = vpop.f32.mrf.mxu0  ;;  %v1640_v9 = vpack.c.bf16 %v1518_v62, %v1517_v6 }
 0x12b   : > { %v914_v63 = vadd.f32 %v3445_v4, %v913_v61  ;;  %v1516_v1 = vsel %vm1378_vm0, %v1388_v60, %v901_v57  ;;  %v1393_v16 = vmax.f32 %v922_v2, 0.0 }
 0x12c   : > { %v2782_v3 = vpop.f32.mrf.mxu0  ;;  %v1639_v5 = vpack.c.bf16 %v1516_v1, %v1515_v0 }
 0x12d   : > { %v925_v8 = vadd.f32 %v2782_v3, %v3445_v4  ;;  %v1391_v13 = vmax.f32 %v914_v63, 0.0  ;;  %v1521_v27 = vsel %vm1378_vm0, %v1393_v16, %v922_v2 }
 0x12e   : > { %v916_v11 = vpop.f32.mrf.mxu0  ;;  %2919 = vmatprep.mubr.bf16.mxu1 %v1639_v5  ;;  %v3159_v5 = vld [vmem:[%s3337_s14 + $0x1f8] sm:$0xff]   ;;  %s2520_s14 = sshll.u32 %s2511_s22, 7 }
 0x12f   : > { %v1394_v14 = vmax.f32 %v925_v8, 0.0  ;;  %v917_v15 = vadd.f32 %v3445_v4, %v916_v11  ;;  %2920 = vmatmul.mubr.bf16.gmra.mxu1 %v1640_v9  ;;  %v1519_v22 = vsel %vm1378_vm0, %v1391_v13, %v914_v63  ;;  %p242_p8 = scmp.lt.s32.totalorder %s2520_s14, 255 }
 0x130   : > { %v2785_v17 = vpop.f32.mrf.mxu0  ;;  %2880 = vmatmul.mubr.bf16.gmra.mxu0 %v3153_v7 }
 0x131   : > { %v1392_v18 = vmax.f32 %v917_v15, 0.0  ;;  %2883 = vmatprep.mubr.bf16.mxu0 %v3154_v10  ;;  %v1522_v20 = vsel %vm1378_vm0, %v1394_v14, %v925_v8  ;;  %v938_v24 = vadd.f32 %v2785_v17, %v3445_v4  ;;  %s4276_s14 = smov (!%p242_p8, %s2520_s14), 255 }
 0x132   : > { %v929_v19 = vpop.f32.mrf.mxu0  ;;  %v1642_v30 = vpack.c.bf16 %v1522_v20, %v1521_v27  ;;  %s2521_s9 = sshll.u32 %s4276_s14, 3 }
 0x133   : > { %v930_v21 = vadd.f32 %v3445_v4, %v929_v19  ;;  %v1520_v23 = vsel %vm1378_vm0, %v1392_v18, %v917_v15  ;;  %v1397_v36 = vmax.f32 %v938_v24, 0.0  ;;  %s3782_s10 = scalar_lea.vmem %s4265_s5, %s2521_s9 }
 0x134   : > { %v2786_v25 = vpop.f32.mrf.mxu0  ;;  %v1641_v26 = vpack.c.bf16 %v1520_v23, %v1519_v22 }
 0x135   : > { %v941_v29 = vadd.f32 %v2786_v25, %v3445_v4  ;;  %v1395_v33 = vmax.f32 %v930_v21, 0.0  ;;  %v1525_v47 = vsel %vm1378_vm0, %v1397_v36, %v938_v24 }
 0x136   : > { %v932_v32 = vpop.f32.mrf.mxu0  ;;  %2923 = vmatprep.mubr.bf16.mxu1 %v1641_v26 }
 0x137   : > { %v1398_v34 = vmax.f32 %v941_v29, 0.0  ;;  %v933_v35 = vadd.f32 %v3445_v4, %v932_v32  ;;  %2924 = vmatmul.mubr.bf16.gmra.mxu1 %v1642_v30  ;;  %v1523_v42 = vsel %vm1378_vm0, %v1395_v33, %v930_v21 }
 0x138   : > { %v2789_v37 = vpop.f32.mrf.mxu0  ;;  %2884 = vmatmul.mubr.bf16.gmra.mxu0 %v3155_v28 }
 0x139   : > { %v1396_v38 = vmax.f32 %v933_v35, 0.0  ;;  %2887 = vmatprep.mubr.bf16.mxu0 %v3156_v31  ;;  %v1526_v40 = vsel %vm1378_vm0, %v1398_v34, %v941_v29  ;;  %v954_v44 = vadd.f32 %v2789_v37, %v3445_v4 }
 0x13a   : > { %v945_v39 = vpop.f32.mrf.mxu0  ;;  %v1644_v50 = vpack.c.bf16 %v1526_v40, %v1525_v47 }
 0x13b   : > { %v946_v41 = vadd.f32 %v3445_v4, %v945_v39  ;;  %v1524_v43 = vsel %vm1378_vm0, %v1396_v38, %v933_v35  ;;  %v1401_v56 = vmax.f32 %v954_v44, 0.0 }
 0x13c   : > { %v2790_v45 = vpop.f32.mrf.mxu0  ;;  %v1643_v46 = vpack.c.bf16 %v1524_v43, %v1523_v42 }
 0x13d   : > { %v957_v49 = vadd.f32 %v2790_v45, %v3445_v4  ;;  %v1399_v53 = vmax.f32 %v946_v41, 0.0  ;;  %v1529_v3 = vsel %vm1378_vm0, %v1401_v56, %v954_v44 }
 0x13e   : > { %v948_v52 = vpop.f32.mrf.mxu0  ;;  %2927 = vmatprep.mubr.bf16.mxu1 %v1643_v46 }
 0x13f   : > { %v1402_v54 = vmax.f32 %v957_v49, 0.0  ;;  %v949_v55 = vadd.f32 %v3445_v4, %v948_v52  ;;  %2928 = vmatmul.mubr.bf16.gmra.mxu1 %v1644_v50  ;;  %v1527_v62 = vsel %vm1378_vm0, %v1399_v53, %v946_v41 }
 0x140   : > { %v2793_v57 = vpop.f32.mrf.mxu0  ;;  %2888 = vmatmul.mubr.bf16.gmra.mxu0 %v3157_v48 }
 0x141   : > { %v1400_v58 = vmax.f32 %v949_v55, 0.0  ;;  %2891 = vmatprep.mubr.bf16.mxu0 %v3158_v51  ;;  %v1530_v60 = vsel %vm1378_vm0, %v1402_v54, %v957_v49  ;;  %v970_v0 = vadd.f32 %v2793_v57, %v3445_v4 }
 0x142   : > { %v961_v59 = vpop.f32.mrf.mxu0  ;;  %v1646_v7 = vpack.c.bf16 %v1530_v60, %v1529_v3 }
 0x143   : > { %v962_v61 = vadd.f32 %v3445_v4, %v961_v59  ;;  %v1528_v63 = vsel %vm1378_vm0, %v1400_v58, %v949_v55  ;;  %v1405_v13 = vmax.f32 %v970_v0, 0.0 }
 0x144   : > { %v2794_v1 = vpop.f32.mrf.mxu0  ;;  %v1645_v2 = vpack.c.bf16 %v1528_v63, %v1527_v62 }
 0x145   : > { %v973_v6 = vadd.f32 %v2794_v1, %v3445_v4  ;;  %v1403_v9 = vmax.f32 %v962_v61, 0.0  ;;  %v1533_v24 = vsel %vm1378_vm0, %v1405_v13, %v970_v0 }
 0x146   : > { %v964_v8 = vpop.f32.mrf.mxu0  ;;  %2931 = vmatprep.mubr.bf16.mxu1 %v1645_v2 }
 0x147   : > { %v1406_v10 = vmax.f32 %v973_v6, 0.0  ;;  %v965_v11 = vadd.f32 %v3445_v4, %v964_v8  ;;  %2932 = vmatmul.mubr.bf16.gmra.mxu1 %v1646_v7  ;;  %v1531_v19 = vsel %vm1378_vm0, %v1403_v9, %v962_v61 }
 0x148   : > { %v2797_v14 = vpop.f32.mrf.mxu0  ;;  %2892 = vmatmul.mubr.bf16.gmra.mxu0 %v3159_v5 }
 0x149   : > { %v1404_v15 = vmax.f32 %v965_v11, 0.0  ;;  %v1534_v17 = vsel %vm1378_vm0, %v1406_v10, %v973_v6  ;;  %v986_v21 = vadd.f32 %v2797_v14, %v3445_v4 }
 0x14a   : > { %v977_v16 = vpop.f32.mrf.mxu0  ;;  %v1648_v26 = vpack.c.bf16 %v1534_v17, %v1533_v24 }
 0x14b   : > { %v978_v18 = vadd.f32 %v3445_v4, %v977_v16  ;;  %v1532_v20 = vsel %vm1378_vm0, %v1404_v15, %v965_v11  ;;  %v1409_v31 = vmax.f32 %v986_v21, 0.0 }
 0x14c   : > { %v2798_v22 = vpop.f32.mrf.mxu0  ;;  %v1647_v23 = vpack.c.bf16 %v1532_v20, %v1531_v19 }
 0x14d   : > { %v989_v25 = vadd.f32 %v2798_v22, %v3445_v4  ;;  %v1407_v28 = vmax.f32 %v978_v18, 0.0  ;;  %v1537_v42 = vsel %vm1378_vm0, %v1409_v31, %v986_v21 }
 0x14e   : > { %v980_v27 = vpop.f32.mrf.mxu0  ;;  %2935 = vmatprep.mubr.bf16.mxu1 %v1647_v23 }
 0x14f   : > { %v1410_v29 = vmax.f32 %v989_v25, 0.0  ;;  %v981_v30 = vadd.f32 %v3445_v4, %v980_v27  ;;  %2936 = vmatmul.mubr.bf16.gmra.mxu1 %v1648_v26  ;;  %v1535_v37 = vsel %vm1378_vm0, %v1407_v28, %v978_v18 }
 0x150   : > { %v2801_v32 = vpop.f32.mrf.mxu0 }
 0x151   : > { %v1408_v33 = vmax.f32 %v981_v30, 0.0  ;;  %v1538_v35 = vsel %vm1378_vm0, %v1410_v29, %v989_v25  ;;  %v1002_v39 = vadd.f32 %v2801_v32, %v3445_v4 }
 0x152   : > { %v993_v34 = vpop.f32.mrf.mxu0  ;;  %v1650_v44 = vpack.c.bf16 %v1538_v35, %v1537_v42 }
 0x153   : > { %v994_v36 = vadd.f32 %v3445_v4, %v993_v34  ;;  %v1536_v38 = vsel %vm1378_vm0, %v1408_v33, %v981_v30  ;;  %v1413_v49 = vmax.f32 %v1002_v39, 0.0 }
 0x154   : > { %v2802_v40 = vpop.f32.mrf.mxu0  ;;  %v1649_v41 = vpack.c.bf16 %v1536_v38, %v1535_v37 }
 0x155   : > { %v1005_v43 = vadd.f32 %v2802_v40, %v3445_v4  ;;  %v1411_v46 = vmax.f32 %v994_v36, 0.0  ;;  %v1541_v60 = vsel %vm1378_vm0, %v1413_v49, %v1002_v39 }
 0x156   : > { %v996_v45 = vpop.f32.mrf.mxu0  ;;  %2939 = vmatprep.mubr.bf16.mxu1 %v1649_v41 }
 0x157   : > { %v1414_v47 = vmax.f32 %v1005_v43, 0.0  ;;  %v997_v48 = vadd.f32 %v3445_v4, %v996_v45  ;;  %2940 = vmatmul.mubr.bf16.gmra.mxu1 %v1650_v44  ;;  %v1539_v55 = vsel %vm1378_vm0, %v1411_v46, %v994_v36 }
 0x158   : > { %v2805_v50 = vpop.f32.mrf.mxu0 }
 0x159   : > { %v1412_v51 = vmax.f32 %v997_v48, 0.0  ;;  %v1542_v53 = vsel %vm1378_vm0, %v1414_v47, %v1005_v43  ;;  %v1018_v57 = vadd.f32 %v2805_v50, %v3445_v4 }
 0x15a   : > { %v1009_v52 = vpop.f32.mrf.mxu0  ;;  %v1652_v62 = vpack.c.bf16 %v1542_v53, %v1541_v60 }
 0x15b   : > { %v1010_v54 = vadd.f32 %v3445_v4, %v1009_v52  ;;  %v1540_v56 = vsel %vm1378_vm0, %v1412_v51, %v997_v48  ;;  %v1417_v3 = vmax.f32 %v1018_v57, 0.0 }
 0x15c   : > { %v2806_v58 = vpop.f32.mrf.mxu0  ;;  %v1651_v59 = vpack.c.bf16 %v1540_v56, %v1539_v55 }
 0x15d   : > { %v1021_v61 = vadd.f32 %v2806_v58, %v3445_v4  ;;  %v1415_v0 = vmax.f32 %v1010_v54, 0.0  ;;  %v1545_v16 = vsel %vm1378_vm0, %v1417_v3, %v1018_v57 }
 0x15e   : > { %v1012_v63 = vpop.f32.mrf.mxu0  ;;  %2943 = vmatprep.mubr.bf16.mxu1 %v1651_v59 }
 0x15f   : > { %v1418_v1 = vmax.f32 %v1021_v61, 0.0  ;;  %v1013_v2 = vadd.f32 %v3445_v4, %v1012_v63  ;;  %2944 = vmatmul.mubr.bf16.gmra.mxu1 %v1652_v62  ;;  %v1543_v10 = vsel %vm1378_vm0, %v1415_v0, %v1010_v54 }
 0x160   : > { %v2809_v5 = vpop.f32.mrf.mxu0 }
 0x161   : > { %v1416_v6 = vmax.f32 %v1013_v2, 0.0  ;;  %v1546_v8 = vsel %vm1378_vm0, %v1418_v1, %v1021_v61  ;;  %v1034_v13 = vadd.f32 %v2809_v5, %v3445_v4 }
 0x162   : > { %v1025_v7 = vpop.f32.mrf.mxu0  ;;  %v1654_v18 = vpack.c.bf16 %v1546_v8, %v1545_v16 }
 0x163   : > { %v1026_v9 = vadd.f32 %v3445_v4, %v1025_v7  ;;  %v1544_v11 = vsel %vm1378_vm0, %v1416_v6, %v1013_v2  ;;  %v1421_v23 = vmax.f32 %v1034_v13, 0.0 }
 0x164   : > { %v2810_v14 = vpop.f32.mrf.mxu0  ;;  %v1653_v15 = vpack.c.bf16 %v1544_v11, %v1543_v10 }
 0x165   : > { %v1037_v17 = vadd.f32 %v2810_v14, %v3445_v4  ;;  %v1419_v20 = vmax.f32 %v1026_v9, 0.0  ;;  %v1549_v34 = vsel %vm1378_vm0, %v1421_v23, %v1034_v13 }
 0x166   : > { %v1028_v19 = vpop.f32.mrf.mxu0  ;;  %2947 = vmatprep.mubr.bf16.mxu1 %v1653_v15 }
 0x167   : > { %v1422_v21 = vmax.f32 %v1037_v17, 0.0  ;;  %v1029_v22 = vadd.f32 %v3445_v4, %v1028_v19  ;;  %2948 = vmatmul.mubr.bf16.gmra.mxu1 %v1654_v18  ;;  %v1547_v29 = vsel %vm1378_vm0, %v1419_v20, %v1026_v9 }
 0x168   : > { %v2813_v24 = vpop.f32.mrf.mxu0 }
 0x169   : > { %v1420_v25 = vmax.f32 %v1029_v22, 0.0  ;;  %v1550_v27 = vsel %vm1378_vm0, %v1422_v21, %v1037_v17  ;;  %v1050_v31 = vadd.f32 %v2813_v24, %v3445_v4 }
 0x16a   : > { %v1041_v26 = vpop.f32.mrf.mxu0  ;;  %v1656_v36 = vpack.c.bf16 %v1550_v27, %v1549_v34 }
 0x16b   : > { %v1042_v28 = vadd.f32 %v3445_v4, %v1041_v26  ;;  %v1548_v30 = vsel %vm1378_vm0, %v1420_v25, %v1029_v22  ;;  %v1425_v41 = vmax.f32 %v1050_v31, 0.0 }
 0x16c   : > { %v2814_v32 = vpop.f32.mrf.mxu0  ;;  %v1655_v33 = vpack.c.bf16 %v1548_v30, %v1547_v29 }
 0x16d   : > { %v1053_v35 = vadd.f32 %v2814_v32, %v3445_v4  ;;  %v1423_v38 = vmax.f32 %v1042_v28, 0.0  ;;  %v1553_v52 = vsel %vm1378_vm0, %v1425_v41, %v1050_v31 }
 0x16e   : > { %v1044_v37 = vpop.f32.mrf.mxu0  ;;  %2951 = vmatprep.mubr.bf16.mxu1 %v1655_v33 }
 0x16f   : > { %v1426_v39 = vmax.f32 %v1053_v35, 0.0  ;;  %v1045_v40 = vadd.f32 %v3445_v4, %v1044_v37  ;;  %2952 = vmatmul.mubr.bf16.gmra.mxu1 %v1656_v36  ;;  %v1551_v47 = vsel %vm1378_vm0, %v1423_v38, %v1042_v28 }
 0x170   : > { %v2817_v42 = vpop.f32.mrf.mxu0 }
 0x171   : > { %v1424_v43 = vmax.f32 %v1045_v40, 0.0  ;;  %v1554_v45 = vsel %vm1378_vm0, %v1426_v39, %v1053_v35  ;;  %v1066_v49 = vadd.f32 %v2817_v42, %v3445_v4 }
 0x172   : > { %v1057_v44 = vpop.f32.mrf.mxu0  ;;  %v1658_v54 = vpack.c.bf16 %v1554_v45, %v1553_v52 }
 0x173   : > { %v1058_v46 = vadd.f32 %v3445_v4, %v1057_v44  ;;  %v1552_v48 = vsel %vm1378_vm0, %v1424_v43, %v1045_v40  ;;  %v1429_v59 = vmax.f32 %v1066_v49, 0.0 }
 0x174   : > { %v2818_v50 = vpop.f32.mrf.mxu0  ;;  %v1657_v51 = vpack.c.bf16 %v1552_v48, %v1551_v47 }
 0x175   : > { %v1069_v53 = vadd.f32 %v2818_v50, %v3445_v4  ;;  %v1427_v56 = vmax.f32 %v1058_v46, 0.0  ;;  %v1557_v7 = vsel %vm1378_vm0, %v1429_v59, %v1066_v49 }
 0x176   : > { %v1060_v55 = vpop.f32.mrf.mxu0  ;;  %2955 = vmatprep.mubr.bf16.mxu1 %v1657_v51 }
 0x177   : > { %v1430_v57 = vmax.f32 %v1069_v53, 0.0  ;;  %v1061_v58 = vadd.f32 %v3445_v4, %v1060_v55  ;;  %2956 = vmatmul.mubr.bf16.gmra.mxu1 %v1658_v54  ;;  %v1555_v1 = vsel %vm1378_vm0, %v1427_v56, %v1058_v46 }
 0x178   : > { %v2821_v60 = vpop.f32.mrf.mxu0 }
 0x179   : > { %v1428_v61 = vmax.f32 %v1061_v58, 0.0  ;;  %v1558_v63 = vsel %vm1378_vm0, %v1430_v57, %v1069_v53  ;;  %v1082_v3 = vadd.f32 %v2821_v60, %v3445_v4 }
 0x17a   : > { %v1073_v62 = vpop.f32.mrf.mxu0  ;;  %v1660_v9 = vpack.c.bf16 %v1558_v63, %v1557_v7 }
 0x17b   : > { %v1074_v0 = vadd.f32 %v3445_v4, %v1073_v62  ;;  %v1556_v2 = vsel %vm1378_vm0, %v1428_v61, %v1061_v58  ;;  %v1433_v15 = vmax.f32 %v1082_v3, 0.0 }
 0x17c   : > { %v2822_v5 = vpop.f32.mrf.mxu0  ;;  %v1659_v6 = vpack.c.bf16 %v1556_v2, %v1555_v1 }
 0x17d   : > { %v1085_v8 = vadd.f32 %v2822_v5, %v3445_v4  ;;  %v1431_v11 = vmax.f32 %v1074_v0, 0.0  ;;  %v1561_v26 = vsel %vm1378_vm0, %v1433_v15, %v1082_v3 }
 0x17e   : > { %v1076_v10 = vpop.f32.mrf.mxu0  ;;  %2959 = vmatprep.mubr.bf16.mxu1 %v1659_v6 }
 0x17f   : > { %v1434_v13 = vmax.f32 %v1085_v8, 0.0  ;;  %v1077_v14 = vadd.f32 %v3445_v4, %v1076_v10  ;;  %2960 = vmatmul.mubr.bf16.gmra.mxu1 %v1660_v9  ;;  %v1559_v21 = vsel %vm1378_vm0, %v1431_v11, %v1074_v0 }
 0x180   : > { %v2825_v16 = vpop.f32.mrf.mxu0 }
 0x181   : > { %v1432_v17 = vmax.f32 %v1077_v14, 0.0  ;;  %v1562_v19 = vsel %vm1378_vm0, %v1434_v13, %v1085_v8  ;;  %v1098_v23 = vadd.f32 %v2825_v16, %v3445_v4 }
 0x182   : > { %v1089_v18 = vpop.f32.mrf.mxu0  ;;  %v1662_v28 = vpack.c.bf16 %v1562_v19, %v1561_v26 }
 0x183   : > { %v1090_v20 = vadd.f32 %v3445_v4, %v1089_v18  ;;  %v1560_v22 = vsel %vm1378_vm0, %v1432_v17, %v1077_v14  ;;  %v1437_v33 = vmax.f32 %v1098_v23, 0.0 }
 0x184   : > { %v2826_v24 = vpop.f32.mrf.mxu0  ;;  %v1661_v25 = vpack.c.bf16 %v1560_v22, %v1559_v21 }
 0x185   : > { %v1101_v27 = vadd.f32 %v2826_v24, %v3445_v4  ;;  %v1435_v30 = vmax.f32 %v1090_v20, 0.0  ;;  %v1565_v44 = vsel %vm1378_vm0, %v1437_v33, %v1098_v23 }
 0x186   : > { %v1092_v29 = vpop.f32.mrf.mxu0  ;;  %2963 = vmatprep.mubr.bf16.mxu1 %v1661_v25 }
 0x187   : > { %v1438_v31 = vmax.f32 %v1101_v27, 0.0  ;;  %v1093_v32 = vadd.f32 %v3445_v4, %v1092_v29  ;;  %2964 = vmatmul.mubr.bf16.gmra.mxu1 %v1662_v28  ;;  %v1563_v39 = vsel %vm1378_vm0, %v1435_v30, %v1090_v20 }
 0x188   : > { %v2829_v34 = vpop.f32.mrf.mxu0 }
 0x189   : > { %v1436_v35 = vmax.f32 %v1093_v32, 0.0  ;;  %v1566_v37 = vsel %vm1378_vm0, %v1438_v31, %v1101_v27  ;;  %v1114_v41 = vadd.f32 %v2829_v34, %v3445_v4 }
 0x18a   : > { %v1105_v36 = vpop.f32.mrf.mxu0  ;;  %v1664_v46 = vpack.c.bf16 %v1566_v37, %v1565_v44 }
 0x18b   : > { %v1106_v38 = vadd.f32 %v3445_v4, %v1105_v36  ;;  %v1564_v40 = vsel %vm1378_vm0, %v1436_v35, %v1093_v32  ;;  %v1441_v51 = vmax.f32 %v1114_v41, 0.0 }
 0x18c   : > { %v2830_v42 = vpop.f32.mrf.mxu0  ;;  %v1663_v43 = vpack.c.bf16 %v1564_v40, %v1563_v39 }
 0x18d   : > { %v1117_v45 = vadd.f32 %v2830_v42, %v3445_v4  ;;  %v1439_v48 = vmax.f32 %v1106_v38, 0.0  ;;  %v1569_v62 = vsel %vm1378_vm0, %v1441_v51, %v1114_v41 }
 0x18e   : > { %v1108_v47 = vpop.f32.mrf.mxu0  ;;  %2967 = vmatprep.mubr.bf16.mxu1 %v1663_v43 }
 0x18f   : > { %v1442_v49 = vmax.f32 %v1117_v45, 0.0  ;;  %v1109_v50 = vadd.f32 %v3445_v4, %v1108_v47  ;;  %2968 = vmatmul.mubr.bf16.gmra.mxu1 %v1664_v46  ;;  %v1567_v57 = vsel %vm1378_vm0, %v1439_v48, %v1106_v38 }
 0x190   : > { %v2833_v52 = vpop.f32.mrf.mxu0 }
 0x191   : > { %v1440_v53 = vmax.f32 %v1109_v50, 0.0  ;;  %v1570_v55 = vsel %vm1378_vm0, %v1442_v49, %v1117_v45  ;;  %v1130_v59 = vadd.f32 %v2833_v52, %v3445_v4 }
 0x192   : > { %v1121_v54 = vpop.f32.mrf.mxu0  ;;  %v1666_v0 = vpack.c.bf16 %v1570_v55, %v1569_v62 }
 0x193   : > { %v1122_v56 = vadd.f32 %v3445_v4, %v1121_v54  ;;  %v1568_v58 = vsel %vm1378_vm0, %v1440_v53, %v1109_v50  ;;  %v1445_v6 = vmax.f32 %v1130_v59, 0.0 }
 0x194   : > { %v2834_v60 = vpop.f32.mrf.mxu0  ;;  %v1665_v61 = vpack.c.bf16 %v1568_v58, %v1567_v57 }
 0x195   : > { %v1133_v63 = vadd.f32 %v2834_v60, %v3445_v4  ;;  %v1443_v2 = vmax.f32 %v1122_v56, 0.0  ;;  %v1573_v18 = vsel %vm1378_vm0, %v1445_v6, %v1130_v59 }
 0x196   : > { %v1124_v1 = vpop.f32.mrf.mxu0  ;;  %2971 = vmatprep.mubr.bf16.mxu1 %v1665_v61 }
 0x197   : > { %v1446_v3 = vmax.f32 %v1133_v63, 0.0  ;;  %v1125_v5 = vadd.f32 %v3445_v4, %v1124_v1  ;;  %2972 = vmatmul.mubr.bf16.gmra.mxu1 %v1666_v0  ;;  %v1571_v13 = vsel %vm1378_vm0, %v1443_v2, %v1122_v56 }
 0x198   : > { %v2837_v7 = vpop.f32.mrf.mxu0 }
 0x199   : > { %v1444_v8 = vmax.f32 %v1125_v5, 0.0  ;;  %v1574_v10 = vsel %vm1378_vm0, %v1446_v3, %v1133_v63  ;;  %v1146_v15 = vadd.f32 %v2837_v7, %v3445_v4 }
 0x19a   : > { %v1137_v9 = vpop.f32.mrf.mxu0  ;;  %v1668_v20 = vpack.c.bf16 %v1574_v10, %v1573_v18 }
 0x19b   : > { %v1138_v11 = vadd.f32 %v3445_v4, %v1137_v9  ;;  %v1572_v14 = vsel %vm1378_vm0, %v1444_v8, %v1125_v5  ;;  %v1449_v25 = vmax.f32 %v1146_v15, 0.0 }
 0x19c   : > { %v2838_v16 = vpop.f32.mrf.mxu0  ;;  %v1667_v17 = vpack.c.bf16 %v1572_v14, %v1571_v13 }
 0x19d   : > { %v1149_v19 = vadd.f32 %v2838_v16, %v3445_v4  ;;  %v1447_v22 = vmax.f32 %v1138_v11, 0.0  ;;  %v1577_v36 = vsel %vm1378_vm0, %v1449_v25, %v1146_v15 }
 0x19e   : > { %v1140_v21 = vpop.f32.mrf.mxu0  ;;  %2975 = vmatprep.mubr.bf16.mxu1 %v1667_v17 }
 0x19f   : > { %v1450_v23 = vmax.f32 %v1149_v19, 0.0  ;;  %v1141_v24 = vadd.f32 %v3445_v4, %v1140_v21  ;;  %2976 = vmatmul.mubr.bf16.gmra.mxu1 %v1668_v20  ;;  %v1575_v31 = vsel %vm1378_vm0, %v1447_v22, %v1138_v11 }
 0x1a0   : > { %v2841_v26 = vpop.f32.mrf.mxu0 }
 0x1a1   : > { %v1448_v27 = vmax.f32 %v1141_v24, 0.0  ;;  %v1578_v29 = vsel %vm1378_vm0, %v1450_v23, %v1149_v19  ;;  %v1162_v33 = vadd.f32 %v2841_v26, %v3445_v4 }
 0x1a2   : > { %v1153_v28 = vpop.f32.mrf.mxu0  ;;  %v1670_v38 = vpack.c.bf16 %v1578_v29, %v1577_v36 }
 0x1a3   : > { %v1154_v30 = vadd.f32 %v3445_v4, %v1153_v28  ;;  %v1576_v32 = vsel %vm1378_vm0, %v1448_v27, %v1141_v24  ;;  %v1453_v43 = vmax.f32 %v1162_v33, 0.0 }
 0x1a4   : > { %v2842_v34 = vpop.f32.mrf.mxu0  ;;  %v1669_v35 = vpack.c.bf16 %v1576_v32, %v1575_v31 }
 0x1a5   : > { %v1165_v37 = vadd.f32 %v2842_v34, %v3445_v4  ;;  %v1451_v40 = vmax.f32 %v1154_v30, 0.0  ;;  %v1581_v54 = vsel %vm1378_vm0, %v1453_v43, %v1162_v33 }
 0x1a6   : > { %v1156_v39 = vpop.f32.mrf.mxu0  ;;  %2979 = vmatprep.mubr.bf16.mxu1 %v1669_v35 }
 0x1a7   : > { %v1454_v41 = vmax.f32 %v1165_v37, 0.0  ;;  %v1157_v42 = vadd.f32 %v3445_v4, %v1156_v39  ;;  %2980 = vmatmul.mubr.bf16.gmra.mxu1 %v1670_v38  ;;  %v1579_v49 = vsel %vm1378_vm0, %v1451_v40, %v1154_v30 }
 0x1a8   : > { %v2845_v44 = vpop.f32.mrf.mxu0 }
 0x1a9   : > { %v1452_v45 = vmax.f32 %v1157_v42, 0.0  ;;  %v1582_v47 = vsel %vm1378_vm0, %v1454_v41, %v1165_v37  ;;  %v1178_v51 = vadd.f32 %v2845_v44, %v3445_v4 }
 0x1aa   : > { %v1169_v46 = vpop.f32.mrf.mxu0  ;;  %v1672_v56 = vpack.c.bf16 %v1582_v47, %v1581_v54 }
 0x1ab   : > { %v1170_v48 = vadd.f32 %v3445_v4, %v1169_v46  ;;  %v1580_v50 = vsel %vm1378_vm0, %v1452_v45, %v1157_v42  ;;  %v1457_v61 = vmax.f32 %v1178_v51, 0.0 }
 0x1ac   : > { %v2846_v52 = vpop.f32.mrf.mxu0  ;;  %v1671_v53 = vpack.c.bf16 %v1580_v50, %v1579_v49 }
 0x1ad   : > { %v1181_v55 = vadd.f32 %v2846_v52, %v3445_v4  ;;  %v1455_v58 = vmax.f32 %v1170_v48, 0.0  ;;  %v1585_v9 = vsel %vm1378_vm0, %v1457_v61, %v1178_v51 }
 0x1ae   : > { %v1172_v57 = vpop.f32.mrf.mxu0  ;;  %2983 = vmatprep.mubr.bf16.mxu1 %v1671_v53 }
 0x1af   : > { %v1458_v59 = vmax.f32 %v1181_v55, 0.0  ;;  %v1173_v60 = vadd.f32 %v3445_v4, %v1172_v57  ;;  %2984 = vmatmul.mubr.bf16.gmra.mxu1 %v1672_v56  ;;  %v1583_v3 = vsel %vm1378_vm0, %v1455_v58, %v1170_v48 }
 0x1b0   : > { %v2849_v62 = vpop.f32.mrf.mxu0 }
 0x1b1   : > { %v1456_v63 = vmax.f32 %v1173_v60, 0.0  ;;  %v1586_v1 = vsel %vm1378_vm0, %v1458_v59, %v1181_v55  ;;  %v1194_v6 = vadd.f32 %v2849_v62, %v3445_v4 }
 0x1b2   : > { %v1185_v0 = vpop.f32.mrf.mxu0  ;;  %v1674_v11 = vpack.c.bf16 %v1586_v1, %v1585_v9 }
 0x1b3   : > { %v1186_v2 = vadd.f32 %v3445_v4, %v1185_v0  ;;  %v1584_v5 = vsel %vm1378_vm0, %v1456_v63, %v1173_v60  ;;  %v1461_v17 = vmax.f32 %v1194_v6, 0.0 }
 0x1b4   : > { %v2850_v7 = vpop.f32.mrf.mxu0  ;;  %v1673_v8 = vpack.c.bf16 %v1584_v5, %v1583_v3 }
 0x1b5   : > { %v1197_v10 = vadd.f32 %v2850_v7, %v3445_v4  ;;  %v1459_v14 = vmax.f32 %v1186_v2, 0.0  ;;  %v1589_v28 = vsel %vm1378_vm0, %v1461_v17, %v1194_v6 }
 0x1b6   : > { %v1188_v13 = vpop.f32.mrf.mxu0  ;;  %2987 = vmatprep.mubr.bf16.mxu1 %v1673_v8 }
 0x1b7   : > { %v1462_v15 = vmax.f32 %v1197_v10, 0.0  ;;  %v1189_v16 = vadd.f32 %v3445_v4, %v1188_v13  ;;  %2988 = vmatmul.mubr.bf16.gmra.mxu1 %v1674_v11  ;;  %v1587_v23 = vsel %vm1378_vm0, %v1459_v14, %v1186_v2 }
 0x1b8   : > { %v2853_v18 = vpop.f32.mrf.mxu0 }
 0x1b9   : > { %v1460_v19 = vmax.f32 %v1189_v16, 0.0  ;;  %v1590_v21 = vsel %vm1378_vm0, %v1462_v15, %v1197_v10  ;;  %v1210_v25 = vadd.f32 %v2853_v18, %v3445_v4 }
 0x1ba   : > { %v1201_v20 = vpop.f32.mrf.mxu0  ;;  %v1676_v30 = vpack.c.bf16 %v1590_v21, %v1589_v28  ;;  %v3758_v21 = vld [vmem:[%s4262_s2] ss:$0 sm:$0xff] }
 0x1bb   : > { %v1202_v22 = vadd.f32 %v3445_v4, %v1201_v20  ;;  %v1588_v24 = vsel %vm1378_vm0, %v1460_v19, %v1189_v16  ;;  %v1465_v35 = vmax.f32 %v1210_v25, 0.0 }
 0x1bc   : > { %v2854_v26 = vpop.f32.mrf.mxu0  ;;  %v1675_v27 = vpack.c.bf16 %v1588_v24, %v1587_v23 }
 0x1bd   : > { %v1213_v29 = vadd.f32 %v2854_v26, %v3445_v4  ;;  %v1463_v32 = vmax.f32 %v1202_v22, 0.0  ;;  %v1593_v46 = vsel %vm1378_vm0, %v1465_v35, %v1210_v25 }
 0x1be   : > { %v1204_v31 = vpop.f32.mrf.mxu0  ;;  %2991 = vmatprep.mubr.bf16.mxu1 %v1675_v27 }
 0x1bf   : > { %v1466_v33 = vmax.f32 %v1213_v29, 0.0  ;;  %v1205_v34 = vadd.f32 %v3445_v4, %v1204_v31  ;;  %2992 = vmatmul.mubr.bf16.gmra.mxu1 %v1676_v30  ;;  %v1591_v41 = vsel %vm1378_vm0, %v1463_v32, %v1202_v22 }
 0x1c0   : > { %v2857_v36 = vpop.f32.mrf.mxu0 }
 0x1c1   : > { %v1464_v37 = vmax.f32 %v1205_v34, 0.0  ;;  %v1594_v39 = vsel %vm1378_vm0, %v1466_v33, %v1213_v29  ;;  %v1226_v43 = vadd.f32 %v2857_v36, %v3445_v4 }
 0x1c2   : > { %v1217_v38 = vpop.f32.mrf.mxu0  ;;  %v1678_v48 = vpack.c.bf16 %v1594_v39, %v1593_v46 }
 0x1c3   : > { %v1218_v40 = vadd.f32 %v3445_v4, %v1217_v38  ;;  %v1592_v42 = vsel %vm1378_vm0, %v1464_v37, %v1205_v34  ;;  %v1469_v53 = vmax.f32 %v1226_v43, 0.0 }
 0x1c4   : > { %v2858_v44 = vpop.f32.mrf.mxu0  ;;  %v1677_v45 = vpack.c.bf16 %v1592_v42, %v1591_v41 }
 0x1c5   : > { %v1229_v47 = vadd.f32 %v2858_v44, %v3445_v4  ;;  %v1467_v50 = vmax.f32 %v1218_v40, 0.0  ;;  %v1597_v0 = vsel %vm1378_vm0, %v1469_v53, %v1226_v43 }
 0x1c6   : > { %v1220_v49 = vpop.f32.mrf.mxu0  ;;  %2995 = vmatprep.mubr.bf16.mxu1 %v1677_v45 }
 0x1c7   : > { %v1470_v51 = vmax.f32 %v1229_v47, 0.0  ;;  %v1221_v52 = vadd.f32 %v3445_v4, %v1220_v49  ;;  %2996 = vmatmul.mubr.bf16.gmra.mxu1 %v1678_v48  ;;  %v1595_v59 = vsel %vm1378_vm0, %v1467_v50, %v1218_v40  ;;  %v3776_v40 = vld [vmem:[%s4264_s4] ss:$0 sm:$0xff] }
 0x1c8   : > { %v2861_v54 = vpop.f32.mrf.mxu0 }
 0x1c9   : > { %v1468_v55 = vmax.f32 %v1221_v52, 0.0  ;;  %v1598_v57 = vsel %vm1378_vm0, %v1470_v51, %v1229_v47  ;;  %v1242_v61 = vadd.f32 %v2861_v54, %v3445_v4 }
 0x1ca   : > { %v1233_v56 = vpop.f32.mrf.mxu0  ;;  %v1680_v2 = vpack.c.bf16 %v1598_v57, %v1597_v0 }
 0x1cb   : > { %v1234_v58 = vadd.f32 %v3445_v4, %v1233_v56  ;;  %v1596_v60 = vsel %vm1378_vm0, %v1468_v55, %v1221_v52  ;;  %v1473_v8 = vmax.f32 %v1242_v61, 0.0 }
 0x1cc   : > { %v2862_v62 = vpop.f32.mrf.mxu0  ;;  %v1679_v63 = vpack.c.bf16 %v1596_v60, %v1595_v59 }
 0x1cd   : > { %v1245_v1 = vadd.f32 %v2862_v62, %v3445_v4  ;;  %v1471_v5 = vmax.f32 %v1234_v58, 0.0  ;;  %v1601_v20 = vsel %vm1378_vm0, %v1473_v8, %v1242_v61 }
 0x1ce   : > { %v1236_v3 = vpop.f32.mrf.mxu0  ;;  %2999 = vmatprep.mubr.bf16.mxu1 %v1679_v63 }
 0x1cf   : > { %v1474_v6 = vmax.f32 %v1245_v1, 0.0  ;;  %v1237_v7 = vadd.f32 %v3445_v4, %v1236_v3  ;;  %3000 = vmatmul.mubr.bf16.gmra.mxu1 %v1680_v2  ;;  %v1599_v15 = vsel %vm1378_vm0, %v1471_v5, %v1234_v58 }
 0x1d0   : > { %v2865_v9 = vpop.f32.mrf.mxu0 }
 0x1d1   : > { %v1472_v10 = vmax.f32 %v1237_v7, 0.0  ;;  %v1602_v13 = vsel %vm1378_vm0, %v1474_v6, %v1245_v1  ;;  %v1258_v17 = vadd.f32 %v2865_v9, %v3445_v4 }
 0x1d2   : > { %v1249_v11 = vpop.f32.mrf.mxu0  ;;  %v1682_v23 = vpack.c.bf16 %v1602_v13, %v1601_v20 }
 0x1d3   : > { %v1250_v14 = vadd.f32 %v3445_v4, %v1249_v11  ;;  %v1600_v16 = vsel %vm1378_vm0, %v1472_v10, %v1237_v7  ;;  %v1477_v27 = vmax.f32 %v1258_v17, 0.0 }
 0x1d4   : > { %v2866_v18 = vpop.f32.mrf.mxu0  ;;  %v1681_v19 = vpack.c.bf16 %v1600_v16, %v1599_v15 }
 0x1d5   : > { %v1261_v22 = vadd.f32 %v3758_v21, %v2866_v18  ;;  %v1475_v25 = vmax.f32 %v1250_v14, 0.0  ;;  %v1605_v38 = vsel %vm1378_vm0, %v1477_v27, %v1258_v17 }
 0x1d6   : > { %v1252_v24 = vpop.f32.mrf.mxu0  ;;  %3003 = vmatprep.mubr.bf16.mxu1 %v1681_v19 }
 0x1d7   : > { %v1478_v26 = vmax.f32 %v1261_v22, 0.0  ;;  %v1253_v4 = vadd.f32 %v3758_v21, %v1252_v24  ;;  %3004 = vmatmul.mubr.bf16.gmra.mxu1 %v1682_v23  ;;  %v1603_v33 = vsel %vm1378_vm0, %v1475_v25, %v1250_v14 }
 0x1d8   : > { %v2869_v28 = vpop.f32.mrf.mxu0 }
 0x1d9   : > { %v1476_v29 = vmax.f32 %v1253_v4, 0.0  ;;  %v1606_v31 = vsel %vm1378_vm0, %v1478_v26, %v1261_v22  ;;  %v1274_v35 = vadd.f32 %v3758_v21, %v2869_v28 }
 0x1da   : > { %v1265_v30 = vpop.f32.mrf.mxu0  ;;  %v1684_v41 = vpack.c.bf16 %v1606_v31, %v1605_v38 }
 0x1db   : > { %v1266_v32 = vadd.f32 %v3758_v21, %v1265_v30  ;;  %v1604_v34 = vsel %vm1378_vm0, %v1476_v29, %v1253_v4  ;;  %v1481_v47 = vmax.f32 %v1274_v35, 0.0 }
 0x1dc   : > { %v2870_v36 = vpop.f32.mrf.mxu0  ;;  %v1683_v37 = vpack.c.bf16 %v1604_v34, %v1603_v33 }
 0x1dd   : > { %v1277_v39 = vadd.f32 %v3758_v21, %v2870_v36  ;;  %v1479_v43 = vmax.f32 %v1266_v32, 0.0  ;;  %v1609_v63 = vsel %vm1378_vm0, %v1481_v47, %v1274_v35 }
 0x1de   : > { %v1268_v42 = vpop.f32.mrf.mxu0  ;;  %3007 = vmatprep.mubr.bf16.mxu1 %v1683_v37 }
 0x1df   : > { %v1482_v44 = vmax.f32 %v1277_v39, 0.0  ;;  %v1269_v45 = vadd.f32 %v3758_v21, %v1268_v42  ;;  %v2913_v46 = vpop.f32.mrf.mxu1  ;;  %3008 = vmatmul.mubr.bf16.gmra.mxu1 %v1684_v41  ;;  %v1607_v57 = vsel %vm1378_vm0, %v1479_v43, %v1266_v32 }
 0x1e0   : > { %v1813_v48 = vadd.f32 %v2913_v46, %v3776_v40  ;;  %v2873_v49 = vpop.f32.mrf.mxu0 }
 0x1e1   : > { %v1480_v50 = vmax.f32 %v1269_v45, 0.0  ;;  %v1804_v51 = vpop.f32.mrf.mxu1  ;;  %v1610_v54 = vsel %vm1378_vm0, %v1482_v44, %v1277_v39  ;;  %v1290_v59 = vadd.f32 %v3758_v21, %v2873_v49 }
 0x1e2   : > { %2318 = vst.msk [vmem:[%s3782_s10 + $0x10] sm:$0xff] %vm2315_vm1, %v1813_v48  ;;  %v1805_v52 = vadd.f32 %v3776_v40, %v1804_v51  ;;  %v1281_v53 = vpop.f32.mrf.mxu0  ;;  %v1686_v2 = vpack.c.bf16 %v1610_v54, %v1609_v63 }
 0x1e3   : > { %v1282_v55 = vadd.f32 %v3758_v21, %v1281_v53  ;;  %v2914_v56 = vpop.f32.mrf.mxu1  ;;  %v1608_v58 = vsel %vm1378_vm0, %v1480_v50, %v1269_v45  ;;  %v1485_v10 = vmax.f32 %v1290_v59, 0.0 }
 0x1e4   : > { %2316 = vst.msk [vmem:[%s3782_s10] sm:$0xff] %vm2315_vm1, %v1805_v52  ;;  %v1816_v60 = vadd.f32 %v2914_v56, %v3776_v40  ;;  %v2874_v61 = vpop.f32.mrf.mxu0  ;;  %v1685_v62 = vpack.c.bf16 %v1608_v58, %v1607_v57 }
 0x1e5   : > { %v1293_v0 = vadd.f32 %v3758_v21, %v2874_v61  ;;  %v1807_v1 = vpop.f32.mrf.mxu1  ;;  %v1483_v6 = vmax.f32 %v1282_v55, 0.0  ;;  %v1613_v27 = vsel %vm1378_vm0, %v1485_v10, %v1290_v59 }
 0x1e6   : > { %2319 = vst.msk [vmem:[%s3782_s10 + $0x18] sm:$0xff] %vm2315_vm1, %v1816_v60  ;;  %v1808_v3 = vadd.f32 %v3776_v40, %v1807_v1  ;;  %v1284_v5 = vpop.f32.mrf.mxu0  ;;  %3011 = vmatprep.mubr.bf16.mxu1 %v1685_v62 }
 0x1e7   : > { %v1486_v7 = vmax.f32 %v1293_v0, 0.0  ;;  %v1285_v8 = vadd.f32 %v3758_v21, %v1284_v5  ;;  %v2917_v9 = vpop.f32.mrf.mxu1  ;;  %3012 = vmatmul.mubr.bf16.gmra.mxu1 %v1686_v2  ;;  %v1611_v22 = vsel %vm1378_vm0, %v1483_v6, %v1282_v55 }
 0x1e8   : > { %2317 = vst.msk [vmem:[%s3782_s10 + $0x8] sm:$0xff] %vm2315_vm1, %v1808_v3  ;;  %v1829_v11 = vadd.f32 %v2917_v9, %v3776_v40  ;;  %v2877_v13 = vpop.f32.mrf.mxu0 }
 0x1e9   : > { %v1484_v14 = vmax.f32 %v1285_v8, 0.0  ;;  %v1820_v15 = vpop.f32.mrf.mxu1  ;;  %v1614_v18 = vsel %vm1378_vm0, %v1486_v7, %v1293_v0  ;;  %v1306_v24 = vadd.f32 %v3758_v21, %v2877_v13 }
 0x1ea   : > { %2322 = vst.msk [vmem:[%s3782_s10 + $0x30] sm:$0xff] %vm2315_vm1, %v1829_v11  ;;  %v1821_v16 = vadd.f32 %v3776_v40, %v1820_v15  ;;  %v1297_v17 = vpop.f32.mrf.mxu0  ;;  %v1688_v30 = vpack.c.bf16 %v1614_v18, %v1613_v27 }
 0x1eb   : > { %v1298_v19 = vadd.f32 %v3758_v21, %v1297_v17  ;;  %v2918_v20 = vpop.f32.mrf.mxu1  ;;  %v1612_v23 = vsel %vm1378_vm0, %v1484_v14, %v1285_v8  ;;  %v1489_v37 = vmax.f32 %v1306_v24, 0.0 }
 0x1ec   : > { %2320 = vst.msk [vmem:[%s3782_s10 + $0x20] sm:$0xff] %vm2315_vm1, %v1821_v16  ;;  %v1832_v25 = vadd.f32 %v2918_v20, %v3776_v40  ;;  %v2878_v26 = vpop.f32.mrf.mxu0  ;;  %v1687_v4 = vpack.c.bf16 %v1612_v23, %v1611_v22 }
 0x1ed   : > { %v1309_v28 = vadd.f32 %v3758_v21, %v2878_v26  ;;  %v1823_v29 = vpop.f32.mrf.mxu1  ;;  %v1487_v33 = vmax.f32 %v1298_v19, 0.0  ;;  %v1617_v54 = vsel %vm1378_vm0, %v1489_v37, %v1306_v24 }
 0x1ee   : > { %2323 = vst.msk [vmem:[%s3782_s10 + $0x38] sm:$0xff] %vm2315_vm1, %v1832_v25  ;;  %v1824_v31 = vadd.f32 %v3776_v40, %v1823_v29  ;;  %v1300_v32 = vpop.f32.mrf.mxu0  ;;  %3015 = vmatprep.mubr.bf16.mxu1 %v1687_v4 }
 0x1ef   : > { %v1490_v34 = vmax.f32 %v1309_v28, 0.0  ;;  %v1301_v35 = vadd.f32 %v3758_v21, %v1300_v32  ;;  %v2921_v36 = vpop.f32.mrf.mxu1  ;;  %3016 = vmatmul.mubr.bf16.gmra.mxu1 %v1688_v30  ;;  %v1615_v48 = vsel %vm1378_vm0, %v1487_v33, %v1298_v19 }
 0x1f0   : > { %2321 = vst.msk [vmem:[%s3782_s10 + $0x28] sm:$0xff] %vm2315_vm1, %v1824_v31  ;;  %v1845_v38 = vadd.f32 %v2921_v36, %v3776_v40  ;;  %v2881_v39 = vpop.f32.mrf.mxu0 }
 0x1f1   : > { %v1488_v41 = vmax.f32 %v1301_v35, 0.0  ;;  %v1836_v42 = vpop.f32.mrf.mxu1  ;;  %v1618_v45 = vsel %vm1378_vm0, %v1490_v34, %v1309_v28  ;;  %v1322_v50 = vadd.f32 %v3758_v21, %v2881_v39 }
 0x1f2   : > { %2326 = vst.msk [vmem:[%s3782_s10 + $0x50] sm:$0xff] %vm2315_vm1, %v1845_v38  ;;  %v1837_v43 = vadd.f32 %v3776_v40, %v1836_v42  ;;  %v1313_v44 = vpop.f32.mrf.mxu0  ;;  %v1690_v57 = vpack.c.bf16 %v1618_v45, %v1617_v54 }
 0x1f3   : > { %v1314_v46 = vadd.f32 %v3758_v21, %v1313_v44  ;;  %v2922_v47 = vpop.f32.mrf.mxu1  ;;  %v1616_v49 = vsel %vm1378_vm0, %v1488_v41, %v1301_v35  ;;  %v1493_v0 = vmax.f32 %v1322_v50, 0.0 }
 0x1f4   : > { %2324 = vst.msk [vmem:[%s3782_s10 + $0x40] sm:$0xff] %vm2315_vm1, %v1837_v43  ;;  %v1848_v51 = vadd.f32 %v2922_v47, %v3776_v40  ;;  %v2882_v52 = vpop.f32.mrf.mxu0  ;;  %v1689_v53 = vpack.c.bf16 %v1616_v49, %v1615_v48 }
 0x1f5   : > { %v1325_v55 = vadd.f32 %v3758_v21, %v2882_v52  ;;  %v1839_v56 = vpop.f32.mrf.mxu1  ;;  %v1491_v60 = vmax.f32 %v1314_v46, 0.0  ;;  %v1621_v14 = vsel %vm1378_vm0, %v1493_v0, %v1322_v50 }
 0x1f6   : > { %2327 = vst.msk [vmem:[%s3782_s10 + $0x58] sm:$0xff] %vm2315_vm1, %v1848_v51  ;;  %v1840_v58 = vadd.f32 %v3776_v40, %v1839_v56  ;;  %v1316_v59 = vpop.f32.mrf.mxu0  ;;  %3019 = vmatprep.mubr.bf16.mxu1 %v1689_v53 }
 0x1f7   : > { %v1494_v61 = vmax.f32 %v1325_v55, 0.0  ;;  %v1317_v62 = vadd.f32 %v3758_v21, %v1316_v59  ;;  %v2925_v63 = vpop.f32.mrf.mxu1  ;;  %3020 = vmatmul.mubr.bf16.gmra.mxu1 %v1690_v57  ;;  %v1619_v11 = vsel %vm1378_vm0, %v1491_v60, %v1314_v46 }
 0x1f8   : > { %2325 = vst.msk [vmem:[%s3782_s10 + $0x48] sm:$0xff] %vm2315_vm1, %v1840_v58  ;;  %v1861_v1 = vadd.f32 %v2925_v63, %v3776_v40  ;;  %v2885_v2 = vpop.f32.mrf.mxu0 }
 0x1f9   : > { %v1492_v3 = vmax.f32 %v1317_v62, 0.0  ;;  %v1852_v5 = vpop.f32.mrf.mxu1  ;;  %v1622_v6 = vsel %vm1378_vm0, %v1494_v61, %v1325_v55  ;;  %v1338_v15 = vadd.f32 %v3758_v21, %v2885_v2 }
 0x1fa   : > { %2330 = vst.msk [vmem:[%s3782_s10 + $0x70] sm:$0xff] %vm2315_vm1, %v1861_v1  ;;  %v1853_v7 = vadd.f32 %v3776_v40, %v1852_v5  ;;  %v1329_v8 = vpop.f32.mrf.mxu0  ;;  %v1692_v19 = vpack.c.bf16 %v1622_v6, %v1621_v14 }
 0x1fb   : > { %v1330_v9 = vadd.f32 %v3758_v21, %v1329_v8  ;;  %v2926_v10 = vpop.f32.mrf.mxu1  ;;  %v1620_v13 = vsel %vm1378_vm0, %v1492_v3, %v1317_v62  ;;  %v1497_v28 = vmax.f32 %v1338_v15, 0.0 }
 0x1fc   : > { %2328 = vst.msk [vmem:[%s3782_s10 + $0x60] sm:$0xff] %vm2315_vm1, %v1853_v7  ;;  %v1864_v16 = vadd.f32 %v2926_v10, %v3776_v40  ;;  %v2886_v17 = vpop.f32.mrf.mxu0  ;;  %v1691_v18 = vpack.c.bf16 %v1620_v13, %v1619_v11 }
 0x1fd   : > { %v1341_v20 = vadd.f32 %v3758_v21, %v2886_v17  ;;  %v1855_v22 = vpop.f32.mrf.mxu1  ;;  %v1495_v25 = vmax.f32 %v1330_v9, 0.0  ;;  %v1625_v41 = vsel %vm1378_vm0, %v1497_v28, %v1338_v15 }
 0x1fe   : > { %2331 = vst.msk [vmem:[%s3782_s10 + $0x78] sm:$0xff] %vm2315_vm1, %v1864_v16  ;;  %v1856_v23 = vadd.f32 %v3776_v40, %v1855_v22  ;;  %v1332_v24 = vpop.f32.mrf.mxu0  ;;  %3023 = vmatprep.mubr.bf16.mxu1 %v1691_v18 }
 0x1ff   : > { %v1498_v26 = vmax.f32 %v1341_v20, 0.0  ;;  %v1333_v4 = vadd.f32 %v3758_v21, %v1332_v24  ;;  %v2929_v27 = vpop.f32.mrf.mxu1  ;;  %3024 = vmatmul.mubr.bf16.gmra.mxu1 %v1692_v19  ;;  %v1623_v38 = vsel %vm1378_vm0, %v1495_v25, %v1330_v9 }
 0x200   : > { %2329 = vst.msk [vmem:[%s3782_s10 + $0x68] sm:$0xff] %vm2315_vm1, %v1856_v23  ;;  %v1877_v29 = vadd.f32 %v2929_v27, %v3776_v40  ;;  %v2889_v30 = vpop.f32.mrf.mxu0 }
 0x201   : > { %v1496_v31 = vmax.f32 %v1333_v4, 0.0  ;;  %v1868_v32 = vpop.f32.mrf.mxu1  ;;  %v1626_v33 = vsel %vm1378_vm0, %v1498_v26, %v1341_v20  ;;  %v1354_v42 = vadd.f32 %v3758_v21, %v2889_v30 }
 0x202   : > { %2334 = vst.msk [vmem:[%s3782_s10 + $0x90] sm:$0xff] %vm2315_vm1, %v1877_v29  ;;  %v1869_v34 = vadd.f32 %v3776_v40, %v1868_v32  ;;  %v1345_v35 = vpop.f32.mrf.mxu0  ;;  %v1694_v46 = vpack.c.bf16 %v1626_v33, %v1625_v41 }
 0x203   : > { %v1346_v36 = vadd.f32 %v3758_v21, %v1345_v35  ;;  %v2930_v37 = vpop.f32.mrf.mxu1  ;;  %v1624_v39 = vsel %vm1378_vm0, %v1496_v31, %v1333_v4  ;;  %v1501_v55 = vmax.f32 %v1354_v42, 0.0 }
 0x204   : > { %2332 = vst.msk [vmem:[%s3782_s10 + $0x80] sm:$0xff] %vm2315_vm1, %v1869_v34  ;;  %v1880_v43 = vadd.f32 %v2930_v37, %v3776_v40  ;;  %v2890_v44 = vpop.f32.mrf.mxu0  ;;  %v1693_v45 = vpack.c.bf16 %v1624_v39, %v1623_v38 }
 0x205   : > { %v1357_v47 = vadd.f32 %v3758_v21, %v2890_v44  ;;  %v1871_v48 = vpop.f32.mrf.mxu1  ;;  %v1499_v51 = vmax.f32 %v1346_v36, 0.0  ;;  %v1629_v3 = vsel %vm1378_vm0, %v1501_v55, %v1354_v42 }
 0x206   : > { %2335 = vst.msk [vmem:[%s3782_s10 + $0x98] sm:$0xff] %vm2315_vm1, %v1880_v43  ;;  %v1872_v49 = vadd.f32 %v3776_v40, %v1871_v48  ;;  %v1348_v50 = vpop.f32.mrf.mxu0  ;;  %3027 = vmatprep.mubr.bf16.mxu1 %v1693_v45 }
 0x207   : > { %v1502_v52 = vmax.f32 %v1357_v47, 0.0  ;;  %v1349_v53 = vadd.f32 %v3758_v21, %v1348_v50  ;;  %v2933_v54 = vpop.f32.mrf.mxu1  ;;  %3028 = vmatmul.mubr.bf16.gmra.mxu1 %v1694_v46  ;;  %v1627_v1 = vsel %vm1378_vm0, %v1499_v51, %v1346_v36 }
 0x208   : > { %2333 = vst.msk [vmem:[%s3782_s10 + $0x88] sm:$0xff] %vm2315_vm1, %v1872_v49  ;;  %v1893_v56 = vadd.f32 %v2933_v54, %v3776_v40  ;;  %v2893_v57 = vpop.f32.mrf.mxu0 }
 0x209   : > { %v1500_v58 = vmax.f32 %v1349_v53, 0.0  ;;  %v1884_v59 = vpop.f32.mrf.mxu1  ;;  %v1630_v60 = vsel %vm1378_vm0, %v1502_v52, %v1357_v47  ;;  %v1370_v5 = vadd.f32 %v3758_v21, %v2893_v57 }
 0x20a   : > { %2338 = vst.msk [vmem:[%s3782_s10 + $0xb0] sm:$0xff] %vm2315_vm1, %v1893_v56  ;;  %v1885_v61 = vadd.f32 %v3776_v40, %v1884_v59  ;;  %v1361_v62 = vpop.f32.mrf.mxu0  ;;  %v1696_v9 = vpack.c.bf16 %v1630_v60, %v1629_v3 }
 0x20b   : > { %v1362_v63 = vadd.f32 %v3758_v21, %v1361_v62  ;;  %v2934_v0 = vpop.f32.mrf.mxu1  ;;  %v1628_v2 = vsel %vm1378_vm0, %v1500_v58, %v1349_v53  ;;  %v1505_v19 = vmax.f32 %v1370_v5, 0.0 }
 0x20c   : > { %2336 = vst.msk [vmem:[%s3782_s10 + $0xa0] sm:$0xff] %vm2315_vm1, %v1885_v61  ;;  %v1896_v6 = vadd.f32 %v2934_v0, %v3776_v40  ;;  %v2894_v7 = vpop.f32.mrf.mxu0  ;;  %v1695_v8 = vpack.c.bf16 %v1628_v2, %v1627_v1 }
 0x20d   : > { %v1373_v10 = vadd.f32 %v3758_v21, %v2894_v7  ;;  %v1887_v11 = vpop.f32.mrf.mxu1  ;;  %v1503_v15 = vmax.f32 %v1362_v63, 0.0  ;;  %v1633_v27 = vsel %vm1378_vm0, %v1505_v19, %v1370_v5 }
 0x20e   : > { %2339 = vst.msk [vmem:[%s3782_s10 + $0xb8] sm:$0xff] %vm2315_vm1, %v1896_v6  ;;  %v1888_v13 = vadd.f32 %v3776_v40, %v1887_v11  ;;  %v1364_v14 = vpop.f32.mrf.mxu0  ;;  %3031 = vmatprep.mubr.bf16.mxu1 %v1695_v8 }
 0x20f   : > { %v1506_v16 = vmax.f32 %v1373_v10, 0.0  ;;  %v1365_v17 = vadd.f32 %v3758_v21, %v1364_v14  ;;  %v2937_v18 = vpop.f32.mrf.mxu1  ;;  %3032 = vmatmul.mubr.bf16.gmra.mxu1 %v1696_v9  ;;  %v1631_v21 = vsel %vm1378_vm0, %v1503_v15, %v1362_v63 }
 0x210   : > { %2337 = vst.msk [vmem:[%s3782_s10 + $0xa8] sm:$0xff] %vm2315_vm1, %v1888_v13  ;;  %v1909_v20 = vadd.f32 %v2937_v18, %v3776_v40 }
 0x211   : > { %v1504_v22 = vmax.f32 %v1365_v17, 0.0  ;;  %v1900_v23 = vpop.f32.mrf.mxu1  ;;  %v1634_v24 = vsel %vm1378_vm0, %v1506_v16, %v1373_v10 }
 0x212   : > { %2342 = vst.msk [vmem:[%s3782_s10 + $0xd0] sm:$0xff] %vm2315_vm1, %v1909_v20  ;;  %v1901_v25 = vadd.f32 %v3776_v40, %v1900_v23  ;;  %v1698_v30 = vpack.c.bf16 %v1634_v24, %v1633_v27 }
 0x213   : > { %v2938_v26 = vpop.f32.mrf.mxu1  ;;  %v1632_v4 = vsel %vm1378_vm0, %v1504_v22, %v1365_v17 }
 0x214   : > { %2340 = vst.msk [vmem:[%s3782_s10 + $0xc0] sm:$0xff] %vm2315_vm1, %v1901_v25  ;;  %v1912_v28 = vadd.f32 %v2938_v26, %v3776_v40  ;;  %v1697_v29 = vpack.c.bf16 %v1632_v4, %v1631_v21 }
 0x215   : > { %v1903_v31 = vpop.f32.mrf.mxu1 }
 0x216   : > { %2343 = vst.msk [vmem:[%s3782_s10 + $0xd8] sm:$0xff] %vm2315_vm1, %v1912_v28  ;;  %v1904_v32 = vadd.f32 %v3776_v40, %v1903_v31  ;;  %3035 = vmatprep.mubr.bf16.mxu1 %v1697_v29 }
 0x217   : > { %v2941_v33 = vpop.f32.mrf.mxu1  ;;  %3036 = vmatmul.mubr.bf16.gmra.mxu1 %v1698_v30 }
 0x218   : > { %2341 = vst.msk [vmem:[%s3782_s10 + $0xc8] sm:$0xff] %vm2315_vm1, %v1904_v32  ;;  %v1925_v12 = vadd.f32 %v2941_v33, %v3776_v40 }
 0x219   : > { %v1916_v34 = vpop.f32.mrf.mxu1 }
 0x21a   : > { %2346 = vst.msk [vmem:[%s3782_s10 + $0xf0] sm:$0xff] %vm2315_vm1, %v1925_v12  ;;  %v1917_v35 = vadd.f32 %v3776_v40, %v1916_v34 }
 0x21b   : > { %v2942_v36 = vpop.f32.mrf.mxu1 }
 0x21c   : > { %2344 = vst.msk [vmem:[%s3782_s10 + $0xe0] sm:$0xff] %vm2315_vm1, %v1917_v35  ;;  %v1928_v37 = vadd.f32 %v2942_v36, %v3776_v40 }
 0x21d   : > { %v1919_v38 = vpop.f32.mrf.mxu1 }
 0x21e   : > { %2347 = vst.msk [vmem:[%s3782_s10 + $0xf8] sm:$0xff] %vm2315_vm1, %v1928_v37  ;;  %v1920_v39 = vadd.f32 %v3776_v40, %v1919_v38 }
 0x21f   : > { %v2945_v41 = vpop.f32.mrf.mxu1 }
 0x220   : > { %2345 = vst.msk [vmem:[%s3782_s10 + $0xe8] sm:$0xff] %vm2315_vm1, %v1920_v39  ;;  %v1941_v42 = vadd.f32 %v2945_v41, %v3776_v40 }
 0x221   : > { %v1932_v43 = vpop.f32.mrf.mxu1 }
 0x222   : > { %2350 = vst.msk [vmem:[%s3782_s10 + $0x110] sm:$0xff] %vm2315_vm1, %v1941_v42  ;;  %v1933_v44 = vadd.f32 %v3776_v40, %v1932_v43 }
 0x223   : > { %v2946_v45 = vpop.f32.mrf.mxu1 }
 0x224   : > { %2348 = vst.msk [vmem:[%s3782_s10 + $0x100] sm:$0xff] %vm2315_vm1, %v1933_v44  ;;  %v1944_v46 = vadd.f32 %v2946_v45, %v3776_v40 }
 0x225   : > { %v1935_v47 = vpop.f32.mrf.mxu1 }
 0x226   : > { %2351 = vst.msk [vmem:[%s3782_s10 + $0x118] sm:$0xff] %vm2315_vm1, %v1944_v46  ;;  %v1936_v48 = vadd.f32 %v3776_v40, %v1935_v47 }
 0x227   : > { %v2949_v49 = vpop.f32.mrf.mxu1 }
 0x228   : > { %2349 = vst.msk [vmem:[%s3782_s10 + $0x108] sm:$0xff] %vm2315_vm1, %v1936_v48  ;;  %v1957_v50 = vadd.f32 %v2949_v49, %v3776_v40 }
 0x229   : > { %v1948_v51 = vpop.f32.mrf.mxu1 }
 0x22a   : > { %2354 = vst.msk [vmem:[%s3782_s10 + $0x130] sm:$0xff] %vm2315_vm1, %v1957_v50  ;;  %v1949_v52 = vadd.f32 %v3776_v40, %v1948_v51 }
 0x22b   : > { %v2950_v53 = vpop.f32.mrf.mxu1 }
 0x22c   : > { %2352 = vst.msk [vmem:[%s3782_s10 + $0x120] sm:$0xff] %vm2315_vm1, %v1949_v52  ;;  %v1960_v54 = vadd.f32 %v2950_v53, %v3776_v40 }
 0x22d   : > { %v1951_v55 = vpop.f32.mrf.mxu1 }
 0x22e   : > { %2355 = vst.msk [vmem:[%s3782_s10 + $0x138] sm:$0xff] %vm2315_vm1, %v1960_v54  ;;  %v1952_v56 = vadd.f32 %v3776_v40, %v1951_v55 }
 0x22f   : > { %v2953_v57 = vpop.f32.mrf.mxu1 }
 0x230   : > { %2353 = vst.msk [vmem:[%s3782_s10 + $0x128] sm:$0xff] %vm2315_vm1, %v1952_v56  ;;  %v1973_v58 = vadd.f32 %v2953_v57, %v3776_v40 }
 0x231   : > { %v1964_v59 = vpop.f32.mrf.mxu1 }
 0x232   : > { %2358 = vst.msk [vmem:[%s3782_s10 + $0x150] sm:$0xff] %vm2315_vm1, %v1973_v58  ;;  %v1965_v60 = vadd.f32 %v3776_v40, %v1964_v59 }
 0x233   : > { %v2954_v61 = vpop.f32.mrf.mxu1 }
 0x234   : > { %2356 = vst.msk [vmem:[%s3782_s10 + $0x140] sm:$0xff] %vm2315_vm1, %v1965_v60  ;;  %v1976_v62 = vadd.f32 %v2954_v61, %v3776_v40 }
 0x235   : > { %v1967_v63 = vpop.f32.mrf.mxu1 }
 0x236   : > { %2359 = vst.msk [vmem:[%s3782_s10 + $0x158] sm:$0xff] %vm2315_vm1, %v1976_v62  ;;  %v1968_v0 = vadd.f32 %v3776_v40, %v1967_v63 }
 0x237   : > { %v2957_v1 = vpop.f32.mrf.mxu1 }
 0x238   : > { %2357 = vst.msk [vmem:[%s3782_s10 + $0x148] sm:$0xff] %vm2315_vm1, %v1968_v0  ;;  %v1989_v2 = vadd.f32 %v2957_v1, %v3776_v40 }
 0x239   : > { %v1980_v3 = vpop.f32.mrf.mxu1 }
 0x23a   : > { %2362 = vst.msk [vmem:[%s3782_s10 + $0x170] sm:$0xff] %vm2315_vm1, %v1989_v2  ;;  %v1981_v5 = vadd.f32 %v3776_v40, %v1980_v3 }
 0x23b   : > { %v2958_v6 = vpop.f32.mrf.mxu1 }
 0x23c   : > { %2360 = vst.msk [vmem:[%s3782_s10 + $0x160] sm:$0xff] %vm2315_vm1, %v1981_v5  ;;  %v1992_v7 = vadd.f32 %v2958_v6, %v3776_v40 }
 0x23d   : > { %v1983_v8 = vpop.f32.mrf.mxu1 }
 0x23e   : > { %2363 = vst.msk [vmem:[%s3782_s10 + $0x178] sm:$0xff] %vm2315_vm1, %v1992_v7  ;;  %v1984_v9 = vadd.f32 %v3776_v40, %v1983_v8 }
 0x23f   : > { %v2961_v10 = vpop.f32.mrf.mxu1 }
 0x240   : > { %2361 = vst.msk [vmem:[%s3782_s10 + $0x168] sm:$0xff] %vm2315_vm1, %v1984_v9  ;;  %v2005_v11 = vadd.f32 %v2961_v10, %v3776_v40 }
 0x241   : > { %v1996_v13 = vpop.f32.mrf.mxu1 }
 0x242   : > { %2366 = vst.msk [vmem:[%s3782_s10 + $0x190] sm:$0xff] %vm2315_vm1, %v2005_v11  ;;  %v1997_v14 = vadd.f32 %v3776_v40, %v1996_v13 }
 0x243   : > { %v2962_v15 = vpop.f32.mrf.mxu1 }
 0x244   : > { %2364 = vst.msk [vmem:[%s3782_s10 + $0x180] sm:$0xff] %vm2315_vm1, %v1997_v14  ;;  %v2008_v16 = vadd.f32 %v2962_v15, %v3776_v40 }
 0x245   : > { %v1999_v17 = vpop.f32.mrf.mxu1 }
 0x246   : > { %2367 = vst.msk [vmem:[%s3782_s10 + $0x198] sm:$0xff] %vm2315_vm1, %v2008_v16  ;;  %v2000_v18 = vadd.f32 %v3776_v40, %v1999_v17 }
 0x247   : > { %v2965_v19 = vpop.f32.mrf.mxu1 }
 0x248   : > { %2365 = vst.msk [vmem:[%s3782_s10 + $0x188] sm:$0xff] %vm2315_vm1, %v2000_v18  ;;  %v2021_v20 = vadd.f32 %v2965_v19, %v3776_v40 }
 0x249   : > { %v2012_v22 = vpop.f32.mrf.mxu1 }
 0x24a   : > { %2370 = vst.msk [vmem:[%s3782_s10 + $0x1b0] sm:$0xff] %vm2315_vm1, %v2021_v20  ;;  %v2013_v23 = vadd.f32 %v3776_v40, %v2012_v22 }
 0x24b   : > { %v2966_v24 = vpop.f32.mrf.mxu1 }
 0x24c   : > { %2368 = vst.msk [vmem:[%s3782_s10 + $0x1a0] sm:$0xff] %vm2315_vm1, %v2013_v23  ;;  %v2024_v25 = vadd.f32 %v2966_v24, %v3776_v40 }
 0x24d   : > { %v2015_v26 = vpop.f32.mrf.mxu1 }
 0x24e   : > { %2371 = vst.msk [vmem:[%s3782_s10 + $0x1b8] sm:$0xff] %vm2315_vm1, %v2024_v25  ;;  %v2016_v21 = vadd.f32 %v3776_v40, %v2015_v26 }
 0x24f   : > { %v2969_v4 = vpop.f32.mrf.mxu1 }
 0x250   : > { %2369 = vst.msk [vmem:[%s3782_s10 + $0x1a8] sm:$0xff] %vm2315_vm1, %v2016_v21  ;;  %v2037_v27 = vadd.f32 %v2969_v4, %v3776_v40 }
 0x251   : > { %v2028_v28 = vpop.f32.mrf.mxu1 }
 0x252   : > { %2374 = vst.msk [vmem:[%s3782_s10 + $0x1d0] sm:$0xff] %vm2315_vm1, %v2037_v27  ;;  %v2029_v29 = vadd.f32 %v3776_v40, %v2028_v28 }
 0x253   : > { %v2970_v30 = vpop.f32.mrf.mxu1 }
 0x254   : > { %2372 = vst.msk [vmem:[%s3782_s10 + $0x1c0] sm:$0xff] %vm2315_vm1, %v2029_v29  ;;  %v2040_v31 = vadd.f32 %v2970_v30, %v3776_v40 }
 0x255   : > { %v2031_v32 = vpop.f32.mrf.mxu1 }
 0x256   : > { %2375 = vst.msk [vmem:[%s3782_s10 + $0x1d8] sm:$0xff] %vm2315_vm1, %v2040_v31  ;;  %v2032_v33 = vadd.f32 %v3776_v40, %v2031_v32 }
 0x257   : > { %v2973_v12 = vpop.f32.mrf.mxu1 }
 0x258   : > { %2373 = vst.msk [vmem:[%s3782_s10 + $0x1c8] sm:$0xff] %vm2315_vm1, %v2032_v33  ;;  %v2053_v34 = vadd.f32 %v2973_v12, %v3776_v40 }
 0x259   : > { %v2044_v35 = vpop.f32.mrf.mxu1 }
 0x25a   : > { %2378 = vst.msk [vmem:[%s3782_s10 + $0x1f0] sm:$0xff] %vm2315_vm1, %v2053_v34  ;;  %v2045_v36 = vadd.f32 %v3776_v40, %v2044_v35 }
 0x25b   : > { %v2974_v37 = vpop.f32.mrf.mxu1 }
 0x25c   : > { %2376 = vst.msk [vmem:[%s3782_s10 + $0x1e0] sm:$0xff] %vm2315_vm1, %v2045_v36  ;;  %v2056_v38 = vadd.f32 %v2974_v37, %v3776_v40 }
 0x25d   : > { %v2047_v39 = vpop.f32.mrf.mxu1 }
 0x25e   : > { %2379 = vst.msk [vmem:[%s3782_s10 + $0x1f8] sm:$0xff] %vm2315_vm1, %v2056_v38  ;;  %v2048_v41 = vadd.f32 %v3776_v40, %v2047_v39 }
 0x25f   : > { %v2977_v42 = vpop.f32.mrf.mxu1 }
 0x260   : > { %2377 = vst.msk [vmem:[%s3782_s10 + $0x1e8] sm:$0xff] %vm2315_vm1, %v2048_v41  ;;  %v2069_v43 = vadd.f32 %v2977_v42, %v3776_v40 }
 0x261   : > { %v2060_v44 = vpop.f32.mrf.mxu1 }
 0x262   : > { %2382 = vst.msk [vmem:[%s3782_s10 + $0x210] sm:$0xff] %vm2315_vm1, %v2069_v43  ;;  %v2061_v45 = vadd.f32 %v3776_v40, %v2060_v44 }
 0x263   : > { %v2978_v46 = vpop.f32.mrf.mxu1 }
 0x264   : > { %2380 = vst.msk [vmem:[%s3782_s10 + $0x200] sm:$0xff] %vm2315_vm1, %v2061_v45  ;;  %v2072_v47 = vadd.f32 %v2978_v46, %v3776_v40 }
 0x265   : > { %v2063_v48 = vpop.f32.mrf.mxu1 }
 0x266   : > { %2383 = vst.msk [vmem:[%s3782_s10 + $0x218] sm:$0xff] %vm2315_vm1, %v2072_v47  ;;  %v2064_v49 = vadd.f32 %v3776_v40, %v2063_v48 }
 0x267   : > { %v2981_v50 = vpop.f32.mrf.mxu1 }
 0x268   : > { %2381 = vst.msk [vmem:[%s3782_s10 + $0x208] sm:$0xff] %vm2315_vm1, %v2064_v49  ;;  %v2085_v51 = vadd.f32 %v2981_v50, %v3776_v40 }
 0x269   : > { %v2076_v52 = vpop.f32.mrf.mxu1 }
 0x26a   : > { %2386 = vst.msk [vmem:[%s3782_s10 + $0x230] sm:$0xff] %vm2315_vm1, %v2085_v51  ;;  %v2077_v53 = vadd.f32 %v3776_v40, %v2076_v52 }
 0x26b   : > { %v2982_v54 = vpop.f32.mrf.mxu1 }
 0x26c   : > { %2384 = vst.msk [vmem:[%s3782_s10 + $0x220] sm:$0xff] %vm2315_vm1, %v2077_v53  ;;  %v2088_v55 = vadd.f32 %v2982_v54, %v3776_v40 }
 0x26d   : > { %v2079_v56 = vpop.f32.mrf.mxu1 }
 0x26e   : > { %2387 = vst.msk [vmem:[%s3782_s10 + $0x238] sm:$0xff] %vm2315_vm1, %v2088_v55  ;;  %v2080_v57 = vadd.f32 %v3776_v40, %v2079_v56 }
 0x26f   : > { %v2985_v58 = vpop.f32.mrf.mxu1 }
 0x270   : > { %2385 = vst.msk [vmem:[%s3782_s10 + $0x228] sm:$0xff] %vm2315_vm1, %v2080_v57  ;;  %v2101_v59 = vadd.f32 %v2985_v58, %v3776_v40 }
 0x271   : > { %v2092_v60 = vpop.f32.mrf.mxu1 }
 0x272   : > { %2390 = vst.msk [vmem:[%s3782_s10 + $0x250] sm:$0xff] %vm2315_vm1, %v2101_v59  ;;  %v2093_v61 = vadd.f32 %v3776_v40, %v2092_v60 }
 0x273   : > { %v2986_v62 = vpop.f32.mrf.mxu1 }
 0x274   : > { %2388 = vst.msk [vmem:[%s3782_s10 + $0x240] sm:$0xff] %vm2315_vm1, %v2093_v61  ;;  %v2104_v63 = vadd.f32 %v2986_v62, %v3776_v40 }
 0x275   : > { %v2095_v0 = vpop.f32.mrf.mxu1 }
 0x276   : > { %2391 = vst.msk [vmem:[%s3782_s10 + $0x258] sm:$0xff] %vm2315_vm1, %v2104_v63  ;;  %v2096_v1 = vadd.f32 %v3776_v40, %v2095_v0 }
 0x277   : > { %v2989_v2 = vpop.f32.mrf.mxu1 }
 0x278   : > { %2389 = vst.msk [vmem:[%s3782_s10 + $0x248] sm:$0xff] %vm2315_vm1, %v2096_v1  ;;  %v2117_v3 = vadd.f32 %v2989_v2, %v3776_v40 }
 0x279   : > { %v2108_v5 = vpop.f32.mrf.mxu1 }
 0x27a   : > { %2394 = vst.msk [vmem:[%s3782_s10 + $0x270] sm:$0xff] %vm2315_vm1, %v2117_v3  ;;  %v2109_v6 = vadd.f32 %v3776_v40, %v2108_v5 }
 0x27b   : > { %v2990_v7 = vpop.f32.mrf.mxu1 }
 0x27c   : > { %2392 = vst.msk [vmem:[%s3782_s10 + $0x260] sm:$0xff] %vm2315_vm1, %v2109_v6  ;;  %v2120_v8 = vadd.f32 %v2990_v7, %v3776_v40 }
 0x27d   : > { %v2111_v9 = vpop.f32.mrf.mxu1 }
 0x27e   : > { %2395 = vst.msk [vmem:[%s3782_s10 + $0x278] sm:$0xff] %vm2315_vm1, %v2120_v8  ;;  %v2112_v10 = vadd.f32 %v3776_v40, %v2111_v9 }
 0x27f   : > { %v2993_v11 = vpop.f32.mrf.mxu1 }
 0x280   : > { %2393 = vst.msk [vmem:[%s3782_s10 + $0x268] sm:$0xff] %vm2315_vm1, %v2112_v10  ;;  %v2133_v13 = vadd.f32 %v2993_v11, %v3776_v40 }
 0x281   : > { %v2124_v14 = vpop.f32.mrf.mxu1 }
 0x282   : > { %2398 = vst.msk [vmem:[%s3782_s10 + $0x290] sm:$0xff] %vm2315_vm1, %v2133_v13  ;;  %v2125_v15 = vadd.f32 %v3776_v40, %v2124_v14 }
 0x283   : > { %v2994_v16 = vpop.f32.mrf.mxu1 }
 0x284   : > { %2396 = vst.msk [vmem:[%s3782_s10 + $0x280] sm:$0xff] %vm2315_vm1, %v2125_v15  ;;  %v2136_v17 = vadd.f32 %v2994_v16, %v3776_v40 }
 0x285   : > { %v2127_v18 = vpop.f32.mrf.mxu1 }
 0x286   : > { %2399 = vst.msk [vmem:[%s3782_s10 + $0x298] sm:$0xff] %vm2315_vm1, %v2136_v17  ;;  %v2128_v19 = vadd.f32 %v3776_v40, %v2127_v18 }
 0x287   : > { %v2997_v20 = vpop.f32.mrf.mxu1 }
 0x288   : > { %2397 = vst.msk [vmem:[%s3782_s10 + $0x288] sm:$0xff] %vm2315_vm1, %v2128_v19  ;;  %v2149_v22 = vadd.f32 %v2997_v20, %v3776_v40 }
 0x289   : > { %v2140_v23 = vpop.f32.mrf.mxu1 }
 0x28a   : > { %2402 = vst.msk [vmem:[%s3782_s10 + $0x2b0] sm:$0xff] %vm2315_vm1, %v2149_v22  ;;  %v2141_v24 = vadd.f32 %v3776_v40, %v2140_v23 }
 0x28b   : > { %v2998_v25 = vpop.f32.mrf.mxu1 }
 0x28c   : > { %2400 = vst.msk [vmem:[%s3782_s10 + $0x2a0] sm:$0xff] %vm2315_vm1, %v2141_v24  ;;  %v2152_v26 = vadd.f32 %v2998_v25, %v3776_v40 }
 0x28d   : > { %v2143_v21 = vpop.f32.mrf.mxu1 }
 0x28e   : > { %2403 = vst.msk [vmem:[%s3782_s10 + $0x2b8] sm:$0xff] %vm2315_vm1, %v2152_v26  ;;  %v2144_v4 = vadd.f32 %v3776_v40, %v2143_v21 }
 0x28f   : > { %v3001_v27 = vpop.f32.mrf.mxu1 }
 0x290   : > { %2401 = vst.msk [vmem:[%s3782_s10 + $0x2a8] sm:$0xff] %vm2315_vm1, %v2144_v4  ;;  %v2165_v28 = vadd.f32 %v3001_v27, %v3776_v40 }
 0x291   : > { %v2156_v29 = vpop.f32.mrf.mxu1 }
 0x292   : > { %2406 = vst.msk [vmem:[%s3782_s10 + $0x2d0] sm:$0xff] %vm2315_vm1, %v2165_v28  ;;  %v2157_v30 = vadd.f32 %v3776_v40, %v2156_v29 }
 0x293   : > { %v3002_v31 = vpop.f32.mrf.mxu1 }
 0x294   : > { %2404 = vst.msk [vmem:[%s3782_s10 + $0x2c0] sm:$0xff] %vm2315_vm1, %v2157_v30  ;;  %v2168_v32 = vadd.f32 %v3002_v31, %v3776_v40 }
 0x295   : > { %v2159_v33 = vpop.f32.mrf.mxu1 }
 0x296   : > { %2407 = vst.msk [vmem:[%s3782_s10 + $0x2d8] sm:$0xff] %vm2315_vm1, %v2168_v32  ;;  %v2160_v12 = vadd.f32 %v3776_v40, %v2159_v33 }
 0x297   : > { %v3005_v34 = vpop.f32.mrf.mxu1 }
 0x298   : > { %2405 = vst.msk [vmem:[%s3782_s10 + $0x2c8] sm:$0xff] %vm2315_vm1, %v2160_v12  ;;  %v2181_v35 = vadd.f32 %v3005_v34, %v3776_v40 }
 0x299   : > { %v2172_v36 = vpop.f32.mrf.mxu1 }
 0x29a   : > { %2410 = vst.msk [vmem:[%s3782_s10 + $0x2f0] sm:$0xff] %vm2315_vm1, %v2181_v35  ;;  %v2173_v37 = vadd.f32 %v3776_v40, %v2172_v36  ;;  %v3161_v36 = vld [vmem:[%s4264_s4] ss:$0 sm:$0xff] }
 0x29b   : > { %v3006_v38 = vpop.f32.mrf.mxu1 }
 0x29c   : > { %2408 = vst.msk [vmem:[%s3782_s10 + $0x2e0] sm:$0xff] %vm2315_vm1, %v2173_v37  ;;  %v2184_v39 = vadd.f32 %v3006_v38, %v3776_v40 }
 0x29d   : > { %v2175_v41 = vpop.f32.mrf.mxu1 }
 0x29e   : > { %2411 = vst.msk [vmem:[%s3782_s10 + $0x2f8] sm:$0xff] %vm2315_vm1, %v2184_v39  ;;  %v2176_v42 = vadd.f32 %v3776_v40, %v2175_v41 }
 0x29f   : > { %v3009_v43 = vpop.f32.mrf.mxu1 }
 0x2a0   : > { %2409 = vst.msk [vmem:[%s3782_s10 + $0x2e8] sm:$0xff] %vm2315_vm1, %v2176_v42  ;;  %v2197_v44 = vadd.f32 %v3009_v43, %v3776_v40 }
 0x2a1   : > { %v2188_v45 = vpop.f32.mrf.mxu1 }
 0x2a2   : > { %2414 = vst.msk [vmem:[%s3782_s10 + $0x310] sm:$0xff] %vm2315_vm1, %v2197_v44  ;;  %v2189_v46 = vadd.f32 %v3776_v40, %v2188_v45 }
 0x2a3   : > { %v3010_v47 = vpop.f32.mrf.mxu1 }
 0x2a4   : > { %2412 = vst.msk [vmem:[%s3782_s10 + $0x300] sm:$0xff] %vm2315_vm1, %v2189_v46  ;;  %v2200_v48 = vadd.f32 %v3010_v47, %v3776_v40 }
 0x2a5   : > { %v2191_v49 = vpop.f32.mrf.mxu1 }
 0x2a6   : > { %2415 = vst.msk [vmem:[%s3782_s10 + $0x318] sm:$0xff] %vm2315_vm1, %v2200_v48  ;;  %v2192_v50 = vadd.f32 %v3776_v40, %v2191_v49 }
 0x2a7   : > { %v3013_v51 = vpop.f32.mrf.mxu1 }
 0x2a8   : > { %2413 = vst.msk [vmem:[%s3782_s10 + $0x308] sm:$0xff] %vm2315_vm1, %v2192_v50  ;;  %v2213_v52 = vadd.f32 %v3013_v51, %v3776_v40 }
 0x2a9   : > { %v2204_v53 = vpop.f32.mrf.mxu1 }
 0x2aa   : > { %2418 = vst.msk [vmem:[%s3782_s10 + $0x330] sm:$0xff] %vm2315_vm1, %v2213_v52  ;;  %v2205_v54 = vadd.f32 %v3776_v40, %v2204_v53 }
 0x2ab   : > { %v3014_v55 = vpop.f32.mrf.mxu1 }
 0x2ac   : > { %2416 = vst.msk [vmem:[%s3782_s10 + $0x320] sm:$0xff] %vm2315_vm1, %v2205_v54  ;;  %v2216_v56 = vadd.f32 %v3014_v55, %v3776_v40 }
 0x2ad   : > { %v2207_v57 = vpop.f32.mrf.mxu1 }
 0x2ae   : > { %2419 = vst.msk [vmem:[%s3782_s10 + $0x338] sm:$0xff] %vm2315_vm1, %v2216_v56  ;;  %v2208_v58 = vadd.f32 %v3776_v40, %v2207_v57 }
 0x2af   : > { %v3017_v59 = vpop.f32.mrf.mxu1 }
 0x2b0   : > { %2417 = vst.msk [vmem:[%s3782_s10 + $0x328] sm:$0xff] %vm2315_vm1, %v2208_v58  ;;  %v2229_v60 = vadd.f32 %v3017_v59, %v3776_v40 }
 0x2b1   : > { %v2220_v61 = vpop.f32.mrf.mxu1 }
 0x2b2   : > { %2422 = vst.msk [vmem:[%s3782_s10 + $0x350] sm:$0xff] %vm2315_vm1, %v2229_v60  ;;  %v2221_v62 = vadd.f32 %v3776_v40, %v2220_v61 }
 0x2b3   : > { %v3018_v63 = vpop.f32.mrf.mxu1 }
 0x2b4   : > { %2420 = vst.msk [vmem:[%s3782_s10 + $0x340] sm:$0xff] %vm2315_vm1, %v2221_v62  ;;  %v2232_v0 = vadd.f32 %v3018_v63, %v3776_v40 }
 0x2b5   : > { %v2223_v1 = vpop.f32.mrf.mxu1 }
 0x2b6   : > { %2423 = vst.msk [vmem:[%s3782_s10 + $0x358] sm:$0xff] %vm2315_vm1, %v2232_v0  ;;  %v2224_v2 = vadd.f32 %v3776_v40, %v2223_v1 }
 0x2b7   : > { %v3021_v3 = vpop.f32.mrf.mxu1 }
 0x2b8   : > { %2421 = vst.msk [vmem:[%s3782_s10 + $0x348] sm:$0xff] %vm2315_vm1, %v2224_v2  ;;  %v2245_v5 = vadd.f32 %v3021_v3, %v3776_v40 }
 0x2b9   : > { %v2236_v6 = vpop.f32.mrf.mxu1 }
 0x2ba   : > { %2426 = vst.msk [vmem:[%s3782_s10 + $0x370] sm:$0xff] %vm2315_vm1, %v2245_v5  ;;  %v2237_v7 = vadd.f32 %v3776_v40, %v2236_v6 }
 0x2bb   : > { %v3022_v8 = vpop.f32.mrf.mxu1 }
 0x2bc   : > { %2424 = vst.msk [vmem:[%s3782_s10 + $0x360] sm:$0xff] %vm2315_vm1, %v2237_v7  ;;  %v2248_v9 = vadd.f32 %v3022_v8, %v3776_v40 }
 0x2bd   : > { %v2239_v10 = vpop.f32.mrf.mxu1 }
 0x2be   : > { %2427 = vst.msk [vmem:[%s3782_s10 + $0x378] sm:$0xff] %vm2315_vm1, %v2248_v9  ;;  %v2240_v11 = vadd.f32 %v3776_v40, %v2239_v10 }
 0x2bf   : > { %v3025_v13 = vpop.f32.mrf.mxu1 }
 0x2c0   : > { %2425 = vst.msk [vmem:[%s3782_s10 + $0x368] sm:$0xff] %vm2315_vm1, %v2240_v11  ;;  %v2261_v14 = vadd.f32 %v3025_v13, %v3776_v40 }
 0x2c1   : > { %v2252_v15 = vpop.f32.mrf.mxu1 }
 0x2c2   : > { %2430 = vst.msk [vmem:[%s3782_s10 + $0x390] sm:$0xff] %vm2315_vm1, %v2261_v14  ;;  %v2253_v16 = vadd.f32 %v3776_v40, %v2252_v15 }
 0x2c3   : > { %v3026_v17 = vpop.f32.mrf.mxu1 }
 0x2c4   : > { %2428 = vst.msk [vmem:[%s3782_s10 + $0x380] sm:$0xff] %vm2315_vm1, %v2253_v16  ;;  %v2264_v18 = vadd.f32 %v3026_v17, %v3776_v40 }
 0x2c5   : > { %v2255_v19 = vpop.f32.mrf.mxu1 }
 0x2c6   : > { %2431 = vst.msk [vmem:[%s3782_s10 + $0x398] sm:$0xff] %vm2315_vm1, %v2264_v18  ;;  %v2256_v20 = vadd.f32 %v3776_v40, %v2255_v19 }
 0x2c7   : > { %v3029_v22 = vpop.f32.mrf.mxu1 }
 0x2c8   : > { %2429 = vst.msk [vmem:[%s3782_s10 + $0x388] sm:$0xff] %vm2315_vm1, %v2256_v20  ;;  %v2277_v23 = vadd.f32 %v3029_v22, %v3776_v40 }
 0x2c9   : > { %v2268_v24 = vpop.f32.mrf.mxu1 }
 0x2ca   : > { %2434 = vst.msk [vmem:[%s3782_s10 + $0x3b0] sm:$0xff] %vm2315_vm1, %v2277_v23  ;;  %v2269_v25 = vadd.f32 %v3776_v40, %v2268_v24 }
 0x2cb   : > { %v3030_v26 = vpop.f32.mrf.mxu1 }
 0x2cc   : > { %2432 = vst.msk [vmem:[%s3782_s10 + $0x3a0] sm:$0xff] %vm2315_vm1, %v2269_v25  ;;  %v2280_v21 = vadd.f32 %v3030_v26, %v3776_v40 }
 0x2cd   : > { %v2271_v4 = vpop.f32.mrf.mxu1 }
 0x2ce   : > { %2435 = vst.msk [vmem:[%s3782_s10 + $0x3b8] sm:$0xff] %vm2315_vm1, %v2280_v21  ;;  %v2272_v27 = vadd.f32 %v3776_v40, %v2271_v4 }
 0x2cf   : > { %v3033_v28 = vpop.f32.mrf.mxu1 }
 0x2d0   : > { %2433 = vst.msk [vmem:[%s3782_s10 + $0x3a8] sm:$0xff] %vm2315_vm1, %v2272_v27  ;;  %v2293_v29 = vadd.f32 %v3033_v28, %v3776_v40 }
 0x2d1   : > { %v2284_v30 = vpop.f32.mrf.mxu1 }
 0x2d2   : > { %2438 = vst.msk [vmem:[%s3782_s10 + $0x3d0] sm:$0xff] %vm2315_vm1, %v2293_v29  ;;  %v2285_v31 = vadd.f32 %v3776_v40, %v2284_v30 }
 0x2d3   : > { %v3034_v32 = vpop.f32.mrf.mxu1 }
 0x2d4   : > { %2436 = vst.msk [vmem:[%s3782_s10 + $0x3c0] sm:$0xff] %vm2315_vm1, %v2285_v31  ;;  %v2296_v33 = vadd.f32 %v3034_v32, %v3776_v40 }
 0x2d5   : > { %v2287_v12 = vpop.f32.mrf.mxu1 }
 0x2d6   : > { %2439 = vst.msk [vmem:[%s3782_s10 + $0x3d8] sm:$0xff] %vm2315_vm1, %v2296_v33  ;;  %v2288_v34 = vadd.f32 %v3776_v40, %v2287_v12 }
 0x2d7   : > { %v3037_v35 = vpop.f32.mrf.mxu1 }
 0x2d8   : > { %2437 = vst.msk [vmem:[%s3782_s10 + $0x3c8] sm:$0xff] %vm2315_vm1, %v2288_v34  ;;  %v2309_v37 = vadd.f32 %v3161_v36, %v3037_v35 }
 0x2d9   : > { %v2300_v38 = vpop.f32.mrf.mxu1 }
 0x2da   : > { %2442 = vst.msk [vmem:[%s3782_s10 + $0x3f0] sm:$0xff] %vm2315_vm1, %v2309_v37  ;;  %v2301_v39 = vadd.f32 %v3161_v36, %v2300_v38 }
 0x2db   : > { %v3038_v41 = vpop.f32.mrf.mxu1 }
 0x2dc   : > { %2440 = vst.msk [vmem:[%s3782_s10 + $0x3e0] sm:$0xff] %vm2315_vm1, %v2301_v39  ;;  %v2312_v42 = vadd.f32 %v3161_v36, %v3038_v41 }
 0x2dd   : > { %v2303_v43 = vpop.f32.mrf.mxu1 }
 0x2de   : > { %2443 = vst.msk [vmem:[%s3782_s10 + $0x3f8] sm:$0xff] %vm2315_vm1, %v2312_v42  ;;  %v2304_v40 = vadd.f32 %v3161_v36, %v2303_v43 }
 0x2e0   : > { %2441 = vst.msk [vmem:[%s3782_s10 + $0x3e8] sm:$0xff] %vm2315_vm1, %v2304_v40 }
 0x2e1 PF: > { %p15_p9 = scmp.ge.s32.totalorder %s3279_s23, 4   ;;  %s4271_s18 = smov %s3216_s19 }
 0x2e2   : > { %s4272_s19 = smov %s3220_s20  ;;  %s4273_s20 = smov %s3289_s26 }
 0x2e3   : > { %s4274_s21 = smov %s3279_s23  ;;  %17 = sbr.rel (!%p15_p9) target bundleno = 3 (0x3), region = 80 }
 0x2e8   :  { %2466 = vsyncpa [#allocation3], 1 }
 0x2e9   :  { %2468 = vsyncpa [#allocation3 + $0x1], 1 }

</bundles_post_ra>
